<compile_context>
chip_gen: v5e
topology: v5e:2x2
jax: 0.10.0
libtpu: 0.0.40
codegen_flags: <defaults>
</compile_context>

<pallas_src>
import functools

import jax
import jax.numpy as jnp
from jax.experimental import pallas as pl
from jax.experimental.pallas import tpu as pltpu

EPS = 1e-5
_MIB = 1024 * 1024


def _round_up(x, m):
    return (x + m - 1) // m * m


def _tpu_vmem_capacity_bytes():
    try:
        return int(pltpu.get_tpu_info().vmem_capacity_bytes)
    except Exception:  # non-TPU trace / older jax: assume v5e/v6e class chip
        return 128 * _MIB


# ----------------------------- Pass A kernel -------------------------------
def _conv_stats_kernel(p_ref, w_ref, y_ref, sum_ref, ssq_ref):
    # p_ref:   (TM, Kp)      im2col patch tile (compute dtype)
    # w_ref:   (Kp, OCp)     flattened conv weight (resident across the grid)
    # y_ref:   (TM, OCp)     raw conv output tile (storage dtype, e.g. bf16)
    # sum_ref: (1, 1, OCp)   this core's per-channel running sum     (f32, resident)
    # ssq_ref: (1, 1, OCp)   this core's per-channel running sum-sq  (f32, resident)
    @pl.when(pl.program_id(1) == 0)
    def _():
        sum_ref[...] = jnp.zeros_like(sum_ref)
        ssq_ref[...] = jnp.zeros_like(ssq_ref)

    y = jnp.dot(p_ref[...], w_ref[...], preferred_element_type=jnp.float32)
    # Stats taken from the f32 MXU result BEFORE the storage cast, so BN stays
    # exact even with bf16 y storage.  Zero-padded M rows contribute exactly 0
    # (we divide by the true M in the wrapper).
    sum_ref[...] += jnp.sum(y, axis=0)[None, None, :]
    ssq_ref[...] += jnp.sum(y * y, axis=0)[None, None, :]
    y_ref[...] = y.astype(y_ref.dtype)


# ----------------------------- Pass B kernel -------------------------------
def _scale_shift_relu_kernel(y_ref, s_ref, b_ref, o_ref):
    # BN already folded to a single per-channel scale/shift in the wrapper:
    # pure FMA + ReLU stream (memory bound; output aliases the y input buffer).
    y = y_ref[...].astype(jnp.float32)
    o_ref[...] = jnp.maximum(y * s_ref[...] + b_ref[...], 0.0).astype(o_ref.dtype)


# ------------------------------ layout glue ---------------------------------
def _im2col_nhwc(x_nhwc, kh, kw, stride, padding):
    """Layout-only glue: extract conv patches. Returns (N*OH*OW, KH*KW*C)."""
    n, h, w, c = x_nhwc.shape
    xp = jnp.pad(x_nhwc, ((0, 0), (padding, padding), (padding, padding), (0, 0)))
    oh = (h + 2 * padding - kh) // stride + 1
    ow = (w + 2 * padding - kw) // stride + 1
    cols = []
    for i in range(kh):
        for j in range(kw):
            patch = xp[:, i:i + (oh - 1) * stride + 1:stride,
                       j:j + (ow - 1) * stride + 1:stride, :]  # (N, OH, OW, C)
            cols.append(patch)
    patches = jnp.stack(cols, axis=3)  # (N, OH, OW, KH*KW, C)
    return patches.reshape(n * oh * ow, kh * kw * c), oh, ow


# -------------------------------- wrapper -----------------------------------
@functools.partial(jax.jit,
                   static_argnames=("stride", "padding", "tm", "compute_dtype"))
def conv_norm_relu(x_nchw, weight, bias, gamma, beta, *, stride=1, padding=0,
                   tm=None, compute_dtype=jnp.bfloat16):
    """x_nchw: (N, IC, H, W); weight: (OC, IC, KH, KW) (PyTorch layout)."""
    del bias  # A per-channel constant is exactly cancelled by the training-mode
    # (batch-stat) BN mean subtraction.  TODO(synk): restore the bias if this
    # kernel is ever reused with eval-mode running statistics.
    oc, ic, kh, kw = weight.shape
    n, _, h, w = x_nchw.shape
    oh = (h + 2 * padding - kh) // stride + 1
    ow = (w + 2 * padding - kw) // stride + 1
    m = n * oh * ow
    k = kh * kw * ic

    in_bytes = jnp.dtype(compute_dtype).itemsize
    store_dtype = compute_dtype                 # y intermediate / output storage
    st_bytes = jnp.dtype(store_dtype).itemsize

    # ---- generation-sized tiling (v5e/v6e: 128 MiB VMEM, v7x: 64 MiB) ----
    vmem_cap = _tpu_vmem_capacity_bytes()
    vmem_limit = min(vmem_cap * 3 // 4, 96 * _MIB)   # 96 MiB v5e/v6e, 48 MiB v7x
    if tm is None:
        tm = 1024 if vmem_cap >= 100 * _MIB else 512

    # Lane-dense padding: full-width MXU pushes, unmasked vst output stores.
    kp = _round_up(k, 128)
    ocp = _round_up(oc, 128)
    sub = 16 if in_bytes == 2 else 8            # bf16 packs 2 rows per sublane

    def _pass_a_vmem(t):
        return (2 * t * kp * in_bytes           # patch tile (double buffered)
                + 2 * kp * ocp * in_bytes       # resident weight (double buffered)
                + 2 * t * ocp * st_bytes        # y tile (double buffered)
                + 8 * ocp * 4)                  # stat accumulators
    while tm > 256 and _pass_a_vmem(tm) > (vmem_limit * 7) // 10:
        tm //= 2

    tm_eff = min(_round_up(tm, sub), _round_up(m, sub))
    n_tiles = pl.cdiv(m, tm_eff)
    ncores = 2 if n_tiles >= 2 else 1           # per-core stats (megacore on v7x)
    mp = _round_up(m, tm_eff * ncores)
    n_tiles_total = mp // tm_eff
    tiles_per_core = n_tiles_total // ncores

    # NCHW -> NHWC, cast to compute dtype BEFORE im2col (halves glue traffic),
    # then im2col + zero pad (layout glue, no extra dtype rewrite).
    x_nhwc = jnp.transpose(x_nchw, (0, 2, 3, 1)).astype(compute_dtype)
    patches, _, _ = _im2col_nhwc(x_nhwc, kh, kw, stride, padding)  # (m, k)
    patches = jnp.pad(patches, ((0, mp - m), (0, kp - k)))

    w_flat = jnp.transpose(weight, (2, 3, 1, 0)).reshape(k, oc)
    w_flat = jnp.pad(w_flat, ((0, kp - k), (0, ocp - oc))).astype(compute_dtype)

    # ---- Pass A: conv matmul + per-core per-channel sum / sum-of-squares ----
    cost_a = pl.CostEstimate(
        flops=int(2 * mp * kp * ocp),
        transcendentals=0,
        bytes_accessed=int(mp * kp * in_bytes + kp * ocp * in_bytes
                           + mp * ocp * st_bytes + 2 * ncores * ocp * 4))
    y_conv, psum, pssq = pl.pallas_call(
        _conv_stats_kernel,
        out_shape=(jax.ShapeDtypeStruct((mp, ocp), store_dtype),
                   jax.ShapeDtypeStruct((ncores, 1, ocp), jnp.float32),
                   jax.ShapeDtypeStruct((ncores, 1, ocp), jnp.float32)),
        grid_spec=pltpu.PrefetchScalarGridSpec(
            num_scalar_prefetch=0,
            grid=(ncores, tiles_per_core),
            in_specs=[
                pl.BlockSpec((tm_eff, kp),
                             lambda c, i: (c * tiles_per_core + i, 0)),
                pl.BlockSpec((kp, ocp), lambda c, i: (0, 0)),
            ],
            out_specs=(
                pl.BlockSpec((tm_eff, ocp),
                             lambda c, i: (c * tiles_per_core + i, 0)),
                pl.BlockSpec((1, 1, ocp), lambda c, i: (c, 0, 0)),
                pl.BlockSpec((1, 1, ocp), lambda c, i: (c, 0, 0)),
            )),
        compiler_params=pltpu.CompilerParams(
            dimension_semantics=("parallel", "arbitrary"),
            vmem_limit_bytes=int(vmem_limit)),
        cost_estimate=cost_a,
    )(patches, w_flat)

    # ---- Fold BN to (scale, shift) once, in the wrapper (tiny (OCp,) math) ----
    ch_sum = jnp.sum(psum, axis=(0, 1))    # tree-combine of per-core partials
    ch_ssq = jnp.sum(pssq, axis=(0, 1))
    inv_m = 1.0 / float(m)
    mean = ch_sum * inv_m
    # TODO(synk): E[y^2]-E[y]^2 can cancel for |mean| >> std at very large M;
    # switch to per-tile Welford-style partial (count, mean, M2) if needed.
    var = jnp.maximum(ch_ssq * inv_m - mean * mean, 0.0)
    inv_std = jax.lax.rsqrt(var + EPS)
    gamma_p = jnp.pad(gamma.astype(jnp.float32), (0, ocp - oc))  # zeros => padded chans -> 0
    beta_p = jnp.pad(beta.astype(jnp.float32), (0, ocp - oc))
    scale = (gamma_p * inv_std).reshape(1, ocp)
    shift = (beta_p - mean * gamma_p * inv_std).reshape(1, ocp)

    # ---- Pass B: per-channel FMA + ReLU, parallel over M tiles -------------
    cost_b = pl.CostEstimate(
        flops=int(3 * mp * ocp),
        transcendentals=0,
        bytes_accessed=int(2 * mp * ocp * st_bytes + 2 * ocp * 4))
    out_padded = pl.pallas_call(
        _scale_shift_relu_kernel,
        out_shape=jax.ShapeDtypeStruct((mp, ocp), store_dtype),
        grid_spec=pltpu.PrefetchScalarGridSpec(
            num_scalar_prefetch=0,
            grid=(n_tiles_total,),
            in_specs=[pl.BlockSpec((tm_eff, ocp), lambda i: (i, 0)),
                      pl.BlockSpec((1, ocp), lambda i: (0, 0)),
                      pl.BlockSpec((1, ocp), lambda i: (0, 0))],
            out_specs=pl.BlockSpec((tm_eff, ocp), lambda i: (i, 0))),
        compiler_params=pltpu.CompilerParams(
            dimension_semantics=("parallel",),   # megacore-shardable
            vmem_limit_bytes=int(vmem_limit)),
        cost_estimate=cost_b,
        input_output_aliases={0: 0},             # reuse y_conv buffer for output
    )(y_conv, scale, shift)

    # (Mp, OCp) -> (M, OC) -> (N, OH, OW, OC) -> NCHW (layout glue).
    # TODO(synk): return NHWC directly (skip this transpose) when the
    # downstream consumer accepts channels-last.
    out = out_padded[:m, :oc].reshape(n, oh, ow, oc)
    return jnp.transpose(out, (0, 3, 1, 2)).astype(x_nchw.dtype)


# ------------------------------ reference -----------------------------------
def _reference(x_nchw, weight, bias, gamma, beta, *, stride, padding):
    """Pure-JAX reference (Conv2d + BatchNorm2d(train) + ReLU), f32."""
    y = jax.lax.conv_general_dilated(
        x_nchw, weight, window_strides=(stride, stride),
        padding=[(padding, padding), (padding, padding)],
        dimension_numbers=("NCHW", "OIHW", "NCHW"))
    y = y + bias.reshape(1, -1, 1, 1)
    mean = jnp.mean(y, axis=(0, 2, 3), keepdims=True)
    var = jnp.mean((y - mean) ** 2, axis=(0, 2, 3), keepdims=True)
    y = (y - mean) * jax.lax.rsqrt(var + EPS)
    y = y * gamma.reshape(1, -1, 1, 1) + beta.reshape(1, -1, 1, 1)
    return jnp.maximum(y, 0.0)


if __name__ == "__main__":
    # ConvNormRelu(in_channels=4, out_channels=8, kernel_size=3, padding=1)
    N, IC, H, W = 2, 4, 16, 16
    OC, KH, KW = 8, 3, 3
    STRIDE, PAD = 1, 1

    key = jax.random.PRNGKey(0)
    kx, kw_, kb = jax.random.split(key, 3)
    x = jax.random.normal(kx, (N, IC, H, W), dtype=jnp.float32)
    fan_in = IC * KH * KW
    bound = 1.0 / (fan_in ** 0.5)
    weight = jax.random.uniform(kw_, (OC, IC, KH, KW), jnp.float32, -bound, bound)
    bias = jax.random.uniform(kb, (OC,), jnp.float32, -bound, bound)
    gamma = jnp.ones((OC,), jnp.float32)   # fresh BatchNorm2d init
    beta = jnp.zeros((OC,), jnp.float32)

    ref = _reference(x, weight, bias, gamma, beta, stride=STRIDE, padding=PAD)

    # Exact-semantics check: f32 MXU inputs + f32 storage, tight tolerance.
    out_f32 = conv_norm_relu(x, weight, bias, gamma, beta, stride=STRIDE,
                             padding=PAD, compute_dtype=jnp.float32)
    out_f32 = jax.block_until_ready(out_f32)
    assert out_f32.shape == (N, OC, H, W), out_f32.shape
    assert jnp.allclose(out_f32, ref, atol=1e-4, rtol=1e-4), \
        float(jnp.max(jnp.abs(out_f32 - ref)))

    # Performance-default path: bf16 MXU inputs + bf16 y/output storage
    # (f32 MXU accumulation, exact f32 BN statistics).
    out_bf16 = conv_norm_relu(x, weight, bias, gamma, beta, stride=STRIDE,
                              padding=PAD, compute_dtype=jnp.bfloat16)
    out_bf16 = jax.block_until_ready(out_bf16)
    assert out_bf16.shape == (N, OC, H, W), out_bf16.shape
    assert jnp.allclose(out_bf16, ref, atol=5e-2, rtol=5e-2), \
        float(jnp.max(jnp.abs(out_bf16 - ref)))

    print("KERNEL_OK")
</pallas_src>

<mosaic_0001>
module attributes {stable_mosaic.version = 11 : i64} {
  func.func @_conv_stats_kernel(%arg0: i32, %arg1: i32, %arg2: memref<512x128xf32, #tpu.memory_space<vmem>>, %arg3: memref<128x128xf32, #tpu.memory_space<vmem>>, %arg4: memref<512x128xf32, #tpu.memory_space<vmem>>, %arg5: memref<1x1x128xf32, #tpu.memory_space<vmem>>, %arg6: memref<1x1x128xf32, #tpu.memory_space<vmem>>) attributes {dimension_semantics = [#tpu.dimension_semantics<parallel>, #tpu.dimension_semantics<arbitrary>], iteration_bounds = array<i64: 1, 1>, scalar_prefetch = 0 : i64, scratch_operands = 0 : i64, tpu.core_type = #tpu.core_type<tc>, window_params = [{transform_indices = @transform_0, window_bounds = array<i64: 512, 128>}, {pipeline_mode = #tpu.pipeline_mode<synchronous>, transform_indices = @transform_1, window_bounds = array<i64: 128, 128>}, {transform_indices = @transform_2, window_bounds = array<i64: 512, 128>}, {transform_indices = @transform_3, window_bounds = array<i64: 1, 1, 128>}, {transform_indices = @transform_4, window_bounds = array<i64: 1, 1, 128>}]} {
    %c0_i32 = arith.constant 0 : i32
    %0 = arith.cmpi eq, %arg1, %c0_i32 : i32
    %1 = arith.extui %0 : i1 to i32
    %c0_i32_0 = arith.constant 0 : i32
    %2 = arith.cmpi ne, %1, %c0_i32_0 : i32
    scf.if %2 {
      %cst_20 = arith.constant 0.000000e+00 : f32
      %18 = vector.broadcast %cst_20 : f32 to vector<1x1x128xf32>
      %c0_21 = arith.constant 0 : index
      %c0_22 = arith.constant 0 : index
      %c0_23 = arith.constant 0 : index
      %19 = vector.load %arg5[%c0_21, %c0_22, %c0_23] : memref<1x1x128xf32, #tpu.memory_space<vmem>>, vector<1x1x128xf32>
      tpu.vector_store %arg5[%c0_21, %c0_22, %c0_23], %18 {strides = array<i32>} : memref<1x1x128xf32, #tpu.memory_space<vmem>>, vector<1x1x128xf32>,
      %cst_24 = arith.constant 0.000000e+00 : f32
      %20 = vector.broadcast %cst_24 : f32 to vector<1x1x128xf32>
      %c0_25 = arith.constant 0 : index
      %c0_26 = arith.constant 0 : index
      %c0_27 = arith.constant 0 : index
      %21 = vector.load %arg6[%c0_25, %c0_26, %c0_27] : memref<1x1x128xf32, #tpu.memory_space<vmem>>, vector<1x1x128xf32>
      tpu.vector_store %arg6[%c0_25, %c0_26, %c0_27], %20 {strides = array<i32>} : memref<1x1x128xf32, #tpu.memory_space<vmem>>, vector<1x1x128xf32>,
    } else {
    }
    %c0 = arith.constant 0 : index
    %c0_1 = arith.constant 0 : index
    %3 = vector.load %arg2[%c0, %c0_1] : memref<512x128xf32, #tpu.memory_space<vmem>>, vector<512x128xf32>
    %c0_2 = arith.constant 0 : index
    %c0_3 = arith.constant 0 : index
    %4 = vector.load %arg3[%c0_2, %c0_3] : memref<128x128xf32, #tpu.memory_space<vmem>>, vector<128x128xf32>
    %cst = arith.constant dense<0.000000e+00> : vector<512x128xf32>
    %5 = tpu.matmul %3, %4, %cst {dimension_numbers = #tpu.dot_dimension_numbers<[1], [0], [0], [1], [0, 0, 1, 1], [], []>} : vector<512x128xf32>, vector<128x128xf32>, vector<512x128xf32> -> vector<512x128xf32>
    %c0_4 = arith.constant 0 : index
    %c0_5 = arith.constant 0 : index
    %c0_6 = arith.constant 0 : index
    %6 = vector.load %arg5[%c0_4, %c0_5, %c0_6] : memref<1x1x128xf32, #tpu.memory_space<vmem>>, vector<1x1x128xf32>
    %cst_7 = arith.constant dense<0.000000e+00> : vector<128xf32>
    %7 = vector.multi_reduction <add>, %5, %cst_7 [0] : vector<512x128xf32> to vector<128xf32>
    %8 = vector.shape_cast %7 : vector<128xf32> to vector<1x1x128xf32>
    %9 = arith.addf %6, %8 : vector<1x1x128xf32>
    %c0_8 = arith.constant 0 : index
    %c0_9 = arith.constant 0 : index
    %c0_10 = arith.constant 0 : index
    %10 = vector.load %arg5[%c0_8, %c0_9, %c0_10] : memref<1x1x128xf32, #tpu.memory_space<vmem>>, vector<1x1x128xf32>
    tpu.vector_store %arg5[%c0_8, %c0_9, %c0_10], %9 {strides = array<i32>} : memref<1x1x128xf32, #tpu.memory_space<vmem>>, vector<1x1x128xf32>,
    %c0_11 = arith.constant 0 : index
    %c0_12 = arith.constant 0 : index
    %c0_13 = arith.constant 0 : index
    %11 = vector.load %arg6[%c0_11, %c0_12, %c0_13] : memref<1x1x128xf32, #tpu.memory_space<vmem>>, vector<1x1x128xf32>
    %12 = arith.mulf %5, %5 : vector<512x128xf32>
    %cst_14 = arith.constant dense<0.000000e+00> : vector<128xf32>
    %13 = vector.multi_reduction <add>, %12, %cst_14 [0] : vector<512x128xf32> to vector<128xf32>
    %14 = vector.shape_cast %13 : vector<128xf32> to vector<1x1x128xf32>
    %15 = arith.addf %11, %14 : vector<1x1x128xf32>
    %c0_15 = arith.constant 0 : index
    %c0_16 = arith.constant 0 : index
    %c0_17 = arith.constant 0 : index
    %16 = vector.load %arg6[%c0_15, %c0_16, %c0_17] : memref<1x1x128xf32, #tpu.memory_space<vmem>>, vector<1x1x128xf32>
    tpu.vector_store %arg6[%c0_15, %c0_16, %c0_17], %15 {strides = array<i32>} : memref<1x1x128xf32, #tpu.memory_space<vmem>>, vector<1x1x128xf32>,
    %c0_18 = arith.constant 0 : index
    %c0_19 = arith.constant 0 : index
    %17 = vector.load %arg4[%c0_18, %c0_19] : memref<512x128xf32, #tpu.memory_space<vmem>>, vector<512x128xf32>
    tpu.vector_store %arg4[%c0_18, %c0_19], %5 {strides = array<i32>} : memref<512x128xf32, #tpu.memory_space<vmem>>, vector<512x128xf32>,
    return
  }
  func.func @transform_0(%arg0: i32, %arg1: i32) -> (i32, i32) {
    %c1_i32 = arith.constant 1 : i32
    %0 = arith.muli %arg0, %c1_i32 : i32
    %1 = arith.addi %0, %arg1 : i32
    %c0_i32 = arith.constant 0 : i32
    %c0_i32_0 = arith.constant 0 : i32
    return %1, %c0_i32 : i32, i32
  }
  func.func @transform_1(%arg0: i32, %arg1: i32) -> (i32, i32) {
    %c0_i32 = arith.constant 0 : i32
    %c0_i32_0 = arith.constant 0 : i32
    %c0_i32_1 = arith.constant 0 : i32
    return %c0_i32, %c0_i32_0 : i32, i32
  }
  func.func @transform_2(%arg0: i32, %arg1: i32) -> (i32, i32) {
    %c1_i32 = arith.constant 1 : i32
    %0 = arith.muli %arg0, %c1_i32 : i32
    %1 = arith.addi %0, %arg1 : i32
    %c0_i32 = arith.constant 0 : i32
    %c0_i32_0 = arith.constant 0 : i32
    return %1, %c0_i32 : i32, i32
  }
  func.func @transform_3(%arg0: i32, %arg1: i32) -> (i32, i32, i32) {
    %c0_i32 = arith.constant 0 : i32
    %c0_i32_0 = arith.constant 0 : i32
    %c0_i32_1 = arith.constant 0 : i32
    return %arg0, %c0_i32, %c0_i32_0 : i32, i32, i32
  }
  func.func @transform_4(%arg0: i32, %arg1: i32) -> (i32, i32, i32) {
    %c0_i32 = arith.constant 0 : i32
    %c0_i32_0 = arith.constant 0 : i32
    %c0_i32_1 = arith.constant 0 : i32
    return %arg0, %c0_i32, %c0_i32_0 : i32, i32, i32
  }
}

module attributes {stable_mosaic.version = 11 : i64} {
  func.func @_scale_shift_relu_kernel(%arg0: i32, %arg1: memref<512x128xf32, #tpu.memory_space<vmem>>, %arg2: memref<1x128xf32, #tpu.memory_space<vmem>>, %arg3: memref<1x128xf32, #tpu.memory_space<vmem>>, %arg4: memref<512x128xf32, #tpu.memory_space<vmem>>) attributes {dimension_semantics = [#tpu.dimension_semantics<parallel>], iteration_bounds = array<i64: 1>, scalar_prefetch = 0 : i64, scratch_operands = 0 : i64, tpu.core_type = #tpu.core_type<tc>, window_params = [{transform_indices = @transform_0, window_bounds = array<i64: 512, 128>}, {pipeline_mode = #tpu.pipeline_mode<synchronous>, transform_indices = @transform_1, window_bounds = array<i64: 1, 128>}, {pipeline_mode = #tpu.pipeline_mode<synchronous>, transform_indices = @transform_2, window_bounds = array<i64: 1, 128>}, {transform_indices = @transform_3, window_bounds = array<i64: 512, 128>}]} {
    %c0 = arith.constant 0 : index
    %c0_0 = arith.constant 0 : index
    %0 = vector.load %arg1[%c0, %c0_0] : memref<512x128xf32, #tpu.memory_space<vmem>>, vector<512x128xf32>
    %c0_1 = arith.constant 0 : index
    %c0_2 = arith.constant 0 : index
    %1 = vector.load %arg2[%c0_1, %c0_2] : memref<1x128xf32, #tpu.memory_space<vmem>>, vector<1x128xf32>
    %2 = vector.broadcast %1 : vector<1x128xf32> to vector<512x128xf32>
    %3 = arith.mulf %0, %2 : vector<512x128xf32>
    %c0_3 = arith.constant 0 : index
    %c0_4 = arith.constant 0 : index
    %4 = vector.load %arg3[%c0_3, %c0_4] : memref<1x128xf32, #tpu.memory_space<vmem>>, vector<1x128xf32>
    %5 = vector.broadcast %4 : vector<1x128xf32> to vector<512x128xf32>
    %6 = arith.addf %3, %5 : vector<512x128xf32>
    %cst = arith.constant 0.000000e+00 : f32
    %7 = vector.broadcast %cst : f32 to vector<512x128xf32>
    %8 = arith.maximumf %6, %7 : vector<512x128xf32>
    %c0_5 = arith.constant 0 : index
    %c0_6 = arith.constant 0 : index
    %9 = vector.load %arg4[%c0_5, %c0_6] : memref<512x128xf32, #tpu.memory_space<vmem>>, vector<512x128xf32>
    tpu.vector_store %arg4[%c0_5, %c0_6], %8 {strides = array<i32>} : memref<512x128xf32, #tpu.memory_space<vmem>>, vector<512x128xf32>,
    return
  }
  func.func @transform_0(%arg0: i32) -> (i32, i32) {
    %c0_i32 = arith.constant 0 : i32
    %c0_i32_0 = arith.constant 0 : i32
    return %arg0, %c0_i32 : i32, i32
  }
  func.func @transform_1(%arg0: i32) -> (i32, i32) {
    %c0_i32 = arith.constant 0 : i32
    %c0_i32_0 = arith.constant 0 : i32
    %c0_i32_1 = arith.constant 0 : i32
    return %c0_i32, %c0_i32_0 : i32, i32
  }
  func.func @transform_2(%arg0: i32) -> (i32, i32) {
    %c0_i32 = arith.constant 0 : i32
    %c0_i32_0 = arith.constant 0 : i32
    %c0_i32_1 = arith.constant 0 : i32
    return %c0_i32, %c0_i32_0 : i32, i32
  }
  func.func @transform_3(%arg0: i32) -> (i32, i32) {
    %c0_i32 = arith.constant 0 : i32
    %c0_i32_0 = arith.constant 0 : i32
    return %arg0, %c0_i32 : i32, i32
  }
}

</mosaic_0001>

<bundles_post_ra>
// kernel: conv_norm_relu.3
= control target key start
LH: loop header
LB: loop body
LE: loop exit
PB: predicated region body
PF: predicated region fallthrough
CT: control target
= control target key end

     0   :  { %s893_s0 = inlined_call_operand.vmem [shape: f32[512,128], index: 0, kind: input, shape index: {}, may-alias: {0,3}]   ;;  %s894_s1 = inlined_call_operand.vmem [shape: f32[1,128], index: 1, kind: input, shape index: {}]   ;;  %s895_s2 = inlined_call_operand.vmem [shape: f32[1,128], index: 2, kind: input, shape index: {}]   ;;  %s896_s3 = inlined_call_operand.vmem [shape: f32[512,128], index: 3, kind: output, shape index: {}, may-alias: {0,3}]  }
   0x1   :  { %v14_v0 = vld [vmem:[%s893_s0] sm:$0xff]  ;;  %v15_v3 = vld [vmem:[%s893_s0 + $0x8] sm:$0xff]  ;;  %v16_v6 = vld [vmem:[%s893_s0 + $0x10] sm:$0xff] }
   0x2   :  { %v374_v1 = vld [vmem:[%s894_s1] ss:$0 sm:$0xff]  ;;  %v17_v7 = vld [vmem:[%s893_s0 + $0x18] sm:$0xff]  ;;  %v19_v12 = vld [vmem:[%s893_s0 + $0x28] sm:$0xff] }
   0x3   :  { %v379_v2 = vld [vmem:[%s895_s2] ss:$0 sm:$0xff]  ;;  %v82_v4 = vmul.f32 %v374_v1, %v14_v0  ;;  %v83_v5 = vmul.f32 %v374_v1, %v15_v3  ;;  %v84_v9 = vmul.f32 %v374_v1, %v16_v6  ;;  %v85_v10 = vmul.f32 %v374_v1, %v17_v7  ;;  %v20_v13 = vld [vmem:[%s893_s0 + $0x30] sm:$0xff]  ;;  %v21_v14 = vld [vmem:[%s893_s0 + $0x38] sm:$0xff] }
   0x4   :  { %v18_v8 = vld [vmem:[%s893_s0 + $0x20] sm:$0xff]  ;;  %v87_v17 = vmul.f32 %v374_v1, %v19_v12  ;;  %v88_v18 = vmul.f32 %v374_v1, %v20_v13  ;;  %v89_v22 = vmul.f32 %v374_v1, %v21_v14  ;;  %v23_v24 = vld [vmem:[%s893_s0 + $0x48] sm:$0xff]  ;;  %v24_v29 = vld [vmem:[%s893_s0 + $0x50] sm:$0xff] }
   0x5   :  { %v86_v11 = vmul.f32 %v374_v1, %v18_v8  ;;  %v150_v15 = vadd.f32 %v379_v2, %v82_v4  ;;  %v151_v16 = vadd.f32 %v379_v2, %v83_v5  ;;  %v152_v19 = vadd.f32 %v379_v2, %v84_v9  ;;  %v22_v23 = vld [vmem:[%s893_s0 + $0x40] sm:$0xff]  ;;  %v25_v30 = vld [vmem:[%s893_s0 + $0x58] sm:$0xff]  ;;  %v27_v35 = vld [vmem:[%s893_s0 + $0x68] sm:$0xff] }
   0x6   :  { %v153_v20 = vadd.f32 %v379_v2, %v85_v10  ;;  %v155_v27 = vadd.f32 %v379_v2, %v87_v17  ;;  %v156_v28 = vadd.f32 %v379_v2, %v88_v18  ;;  %v26_v31 = vld [vmem:[%s893_s0 + $0x60] sm:$0xff]  ;;  %v157_v34 = vadd.f32 %v379_v2, %v89_v22  ;;  %v28_v36 = vld [vmem:[%s893_s0 + $0x70] sm:$0xff] }
   0x7   :  { %v154_v21 = vadd.f32 %v379_v2, %v86_v11  ;;  %v214_v25 = vmax.f32 %v150_v15, 0.0  ;;  %v215_v26 = vmax.f32 %v151_v16, 0.0  ;;  %v216_v32 = vmax.f32 %v152_v19, 0.0 }
   0x8   :  { %v217_v33 = vmax.f32 %v153_v20, 0.0  ;;  %v219_v38 = vmax.f32 %v155_v27, 0.0  ;;  %v90_v39 = vmul.f32 %v374_v1, %v22_v23  ;;  %v91_v40 = vmul.f32 %v374_v1, %v23_v24 }
   0x9   :  { %278 = vst [vmem:[%s896_s3] sm:$0xff] %v214_v25  ;;  %v218_v37 = vmax.f32 %v154_v21, 0.0  ;;  %v220_v42 = vmax.f32 %v156_v28, 0.0  ;;  %v92_v43 = vmul.f32 %v374_v1, %v24_v29  ;;  %v93_v44 = vmul.f32 %v374_v1, %v25_v30 }
   0xa   :  { %v94_v45 = vmul.f32 %v374_v1, %v26_v31  ;;  %v158_v46 = vadd.f32 %v379_v2, %v90_v39  ;;  %v159_v47 = vadd.f32 %v379_v2, %v91_v40  ;;  %v95_v48 = vmul.f32 %v374_v1, %v27_v35 }
   0xb   :  { %v96_v49 = vmul.f32 %v374_v1, %v28_v36  ;;  %v221_v50 = vmax.f32 %v157_v34, 0.0  ;;  %v160_v51 = vadd.f32 %v379_v2, %v92_v43  ;;  %v161_v52 = vadd.f32 %v379_v2, %v93_v44 }
   0xc   :  { %v222_v56 = vmax.f32 %v158_v46, 0.0  ;;  %v162_v57 = vadd.f32 %v379_v2, %v94_v45  ;;  %v223_v60 = vmax.f32 %v159_v47, 0.0  ;;  %v163_v61 = vadd.f32 %v379_v2, %v95_v48 }
   0xd   :  { %v224_v63 = vmax.f32 %v160_v51, 0.0  ;;  %v164_v0 = vadd.f32 %v379_v2, %v96_v49  ;;  %v225_v6 = vmax.f32 %v161_v52, 0.0 }
   0xe   :  { %v226_v11 = vmax.f32 %v162_v57, 0.0  ;;  %v227_v15 = vmax.f32 %v163_v61, 0.0 }
   0xf   :  { %v228_v19 = vmax.f32 %v164_v0, 0.0 }
  0x10   :  { %v29_v41 = vld [vmem:[%s893_s0 + $0x78] sm:$0xff] }
  0x11   :  { %279 = vst [vmem:[%s896_s3 + $0x8] sm:$0xff] %v215_v26  ;;  %v97_v53 = vmul.f32 %v374_v1, %v29_v41 }
  0x12   :  { %280 = vst [vmem:[%s896_s3 + $0x10] sm:$0xff] %v216_v32 }
  0x13   :  { %281 = vst [vmem:[%s896_s3 + $0x18] sm:$0xff] %v217_v33  ;;  %v165_v7 = vadd.f32 %v379_v2, %v97_v53 }
  0x15   :  { %v229_v23 = vmax.f32 %v165_v7, 0.0 }
  0x1a   :  { %v30_v54 = vld [vmem:[%s893_s0 + $0x80] sm:$0xff]  ;;  %v31_v55 = vld [vmem:[%s893_s0 + $0x88] sm:$0xff] }
  0x1b   :  { %282 = vst [vmem:[%s896_s3 + $0x20] sm:$0xff] %v218_v37  ;;  %v98_v3 = vmul.f32 %v374_v1, %v30_v54  ;;  %v99_v4 = vmul.f32 %v374_v1, %v31_v55 }
  0x1d   :  { %v166_v12 = vadd.f32 %v379_v2, %v98_v3  ;;  %v167_v16 = vadd.f32 %v379_v2, %v99_v4 }
  0x1f   :  { %v230_v27 = vmax.f32 %v166_v12, 0.0  ;;  %v231_v31 = vmax.f32 %v167_v16, 0.0 }
  0x22   :  { %v32_v58 = vld [vmem:[%s893_s0 + $0x90] sm:$0xff]  ;;  %v33_v59 = vld [vmem:[%s893_s0 + $0x98] sm:$0xff] }
  0x23   :  { %283 = vst [vmem:[%s896_s3 + $0x28] sm:$0xff] %v219_v38  ;;  %v100_v8 = vmul.f32 %v374_v1, %v32_v58  ;;  %v101_v9 = vmul.f32 %v374_v1, %v33_v59 }
  0x25   :  { %v168_v20 = vadd.f32 %v379_v2, %v100_v8  ;;  %v169_v24 = vadd.f32 %v379_v2, %v101_v9 }
  0x27   :  { %v232_v35 = vmax.f32 %v168_v20, 0.0  ;;  %v233_v39 = vmax.f32 %v169_v24, 0.0 }
  0x2a   :  { %v34_v62 = vld [vmem:[%s893_s0 + $0xa0] sm:$0xff] }
  0x2b   :  { %284 = vst [vmem:[%s896_s3 + $0x30] sm:$0xff] %v220_v42  ;;  %v102_v13 = vmul.f32 %v374_v1, %v34_v62 }
  0x2d   :  { %v170_v28 = vadd.f32 %v379_v2, %v102_v13 }
  0x2f   :  { %v234_v43 = vmax.f32 %v170_v28, 0.0 }
  0x32   :  { %v35_v5 = vld [vmem:[%s893_s0 + $0xa8] sm:$0xff] }
  0x33   :  { %285 = vst [vmem:[%s896_s3 + $0x38] sm:$0xff] %v221_v50  ;;  %v103_v17 = vmul.f32 %v374_v1, %v35_v5 }
  0x35   :  { %v171_v32 = vadd.f32 %v379_v2, %v103_v17 }
  0x37   :  { %v235_v47 = vmax.f32 %v171_v32, 0.0 }
  0x3a   :  { %v36_v10 = vld [vmem:[%s893_s0 + $0xb0] sm:$0xff] }
  0x3b   :  { %286 = vst [vmem:[%s896_s3 + $0x40] sm:$0xff] %v222_v56  ;;  %v104_v21 = vmul.f32 %v374_v1, %v36_v10 }
  0x3d   :  { %v172_v36 = vadd.f32 %v379_v2, %v104_v21 }
  0x3f   :  { %v236_v51 = vmax.f32 %v172_v36, 0.0 }
  0x42   :  { %v37_v14 = vld [vmem:[%s893_s0 + $0xb8] sm:$0xff] }
  0x43   :  { %287 = vst [vmem:[%s896_s3 + $0x48] sm:$0xff] %v223_v60  ;;  %v105_v25 = vmul.f32 %v374_v1, %v37_v14 }
  0x45   :  { %v173_v40 = vadd.f32 %v379_v2, %v105_v25 }
  0x47   :  { %v237_v55 = vmax.f32 %v173_v40, 0.0 }
  0x4a   :  { %v38_v18 = vld [vmem:[%s893_s0 + $0xc0] sm:$0xff] }
  0x4b   :  { %288 = vst [vmem:[%s896_s3 + $0x50] sm:$0xff] %v224_v63  ;;  %v106_v29 = vmul.f32 %v374_v1, %v38_v18 }
  0x4d   :  { %v174_v44 = vadd.f32 %v379_v2, %v106_v29 }
  0x4f   :  { %v238_v59 = vmax.f32 %v174_v44, 0.0 }
  0x52   :  { %v39_v22 = vld [vmem:[%s893_s0 + $0xc8] sm:$0xff] }
  0x53   :  { %289 = vst [vmem:[%s896_s3 + $0x58] sm:$0xff] %v225_v6  ;;  %v107_v33 = vmul.f32 %v374_v1, %v39_v22 }
  0x55   :  { %v175_v48 = vadd.f32 %v379_v2, %v107_v33 }
  0x57   :  { %v239_v63 = vmax.f32 %v175_v48, 0.0 }
  0x5a   :  { %v40_v26 = vld [vmem:[%s893_s0 + $0xd0] sm:$0xff] }
  0x5b   :  { %290 = vst [vmem:[%s896_s3 + $0x60] sm:$0xff] %v226_v11  ;;  %v108_v37 = vmul.f32 %v374_v1, %v40_v26 }
  0x5d   :  { %v176_v52 = vadd.f32 %v379_v2, %v108_v37 }
  0x5f   :  { %v240_v5 = vmax.f32 %v176_v52, 0.0 }
  0x62   :  { %v41_v30 = vld [vmem:[%s893_s0 + $0xd8] sm:$0xff] }
  0x63   :  { %291 = vst [vmem:[%s896_s3 + $0x68] sm:$0xff] %v227_v15  ;;  %v109_v41 = vmul.f32 %v374_v1, %v41_v30 }
  0x65   :  { %v177_v56 = vadd.f32 %v379_v2, %v109_v41 }
  0x67   :  { %v241_v9 = vmax.f32 %v177_v56, 0.0 }
  0x6a   :  { %v42_v34 = vld [vmem:[%s893_s0 + $0xe0] sm:$0xff] }
  0x6b   :  { %292 = vst [vmem:[%s896_s3 + $0x70] sm:$0xff] %v228_v19  ;;  %v110_v45 = vmul.f32 %v374_v1, %v42_v34 }
  0x6d   :  { %v178_v60 = vadd.f32 %v379_v2, %v110_v45 }
  0x6f   :  { %v242_v13 = vmax.f32 %v178_v60, 0.0 }
  0x72   :  { %v43_v38 = vld [vmem:[%s893_s0 + $0xe8] sm:$0xff] }
  0x73   :  { %293 = vst [vmem:[%s896_s3 + $0x78] sm:$0xff] %v229_v23  ;;  %v111_v49 = vmul.f32 %v374_v1, %v43_v38 }
  0x75   :  { %v179_v0 = vadd.f32 %v379_v2, %v111_v49 }
  0x77   :  { %v243_v17 = vmax.f32 %v179_v0, 0.0 }
  0x7a   :  { %v44_v42 = vld [vmem:[%s893_s0 + $0xf0] sm:$0xff] }
  0x7b   :  { %294 = vst [vmem:[%s896_s3 + $0x80] sm:$0xff] %v230_v27  ;;  %v112_v53 = vmul.f32 %v374_v1, %v44_v42 }
  0x7d   :  { %v180_v6 = vadd.f32 %v379_v2, %v112_v53 }
  0x7f   :  { %v244_v21 = vmax.f32 %v180_v6, 0.0 }
  0x82   :  { %v45_v46 = vld [vmem:[%s893_s0 + $0xf8] sm:$0xff] }
  0x83   :  { %295 = vst [vmem:[%s896_s3 + $0x88] sm:$0xff] %v231_v31  ;;  %v113_v57 = vmul.f32 %v374_v1, %v45_v46 }
  0x85   :  { %v181_v10 = vadd.f32 %v379_v2, %v113_v57 }
  0x87   :  { %v245_v25 = vmax.f32 %v181_v10, 0.0 }
  0x8a   :  { %v46_v50 = vld [vmem:[%s893_s0 + $0x100] sm:$0xff] }
  0x8b   :  { %296 = vst [vmem:[%s896_s3 + $0x90] sm:$0xff] %v232_v35  ;;  %v114_v61 = vmul.f32 %v374_v1, %v46_v50 }
  0x8d   :  { %v182_v14 = vadd.f32 %v379_v2, %v114_v61 }
  0x8f   :  { %v246_v29 = vmax.f32 %v182_v14, 0.0 }
  0x92   :  { %v47_v54 = vld [vmem:[%s893_s0 + $0x108] sm:$0xff] }
  0x93   :  { %297 = vst [vmem:[%s896_s3 + $0x98] sm:$0xff] %v233_v39  ;;  %v115_v3 = vmul.f32 %v374_v1, %v47_v54 }
  0x95   :  { %v183_v18 = vadd.f32 %v379_v2, %v115_v3 }
  0x97   :  { %v247_v33 = vmax.f32 %v183_v18, 0.0 }
  0x9a   :  { %v48_v58 = vld [vmem:[%s893_s0 + $0x110] sm:$0xff] }
  0x9b   :  { %298 = vst [vmem:[%s896_s3 + $0xa0] sm:$0xff] %v234_v43  ;;  %v116_v7 = vmul.f32 %v374_v1, %v48_v58 }
  0x9d   :  { %v184_v22 = vadd.f32 %v379_v2, %v116_v7 }
  0x9f   :  { %v248_v37 = vmax.f32 %v184_v22, 0.0 }
  0xa2   :  { %v49_v62 = vld [vmem:[%s893_s0 + $0x118] sm:$0xff] }
  0xa3   :  { %299 = vst [vmem:[%s896_s3 + $0xa8] sm:$0xff] %v235_v47  ;;  %v117_v11 = vmul.f32 %v374_v1, %v49_v62 }
  0xa5   :  { %v185_v26 = vadd.f32 %v379_v2, %v117_v11 }
  0xa7   :  { %v249_v41 = vmax.f32 %v185_v26, 0.0 }
  0xaa   :  { %v50_v4 = vld [vmem:[%s893_s0 + $0x120] sm:$0xff] }
  0xab   :  { %300 = vst [vmem:[%s896_s3 + $0xb0] sm:$0xff] %v236_v51  ;;  %v118_v15 = vmul.f32 %v374_v1, %v50_v4 }
  0xad   :  { %v186_v30 = vadd.f32 %v379_v2, %v118_v15 }
  0xaf   :  { %v250_v45 = vmax.f32 %v186_v30, 0.0 }
  0xb2   :  { %v51_v8 = vld [vmem:[%s893_s0 + $0x128] sm:$0xff] }
  0xb3   :  { %301 = vst [vmem:[%s896_s3 + $0xb8] sm:$0xff] %v237_v55  ;;  %v119_v19 = vmul.f32 %v374_v1, %v51_v8 }
  0xb5   :  { %v187_v34 = vadd.f32 %v379_v2, %v119_v19 }
  0xb7   :  { %v251_v49 = vmax.f32 %v187_v34, 0.0 }
  0xba   :  { %v52_v12 = vld [vmem:[%s893_s0 + $0x130] sm:$0xff] }
  0xbb   :  { %302 = vst [vmem:[%s896_s3 + $0xc0] sm:$0xff] %v238_v59  ;;  %v120_v23 = vmul.f32 %v374_v1, %v52_v12 }
  0xbd   :  { %v188_v38 = vadd.f32 %v379_v2, %v120_v23 }
  0xbf   :  { %v252_v53 = vmax.f32 %v188_v38, 0.0 }
  0xc2   :  { %v53_v16 = vld [vmem:[%s893_s0 + $0x138] sm:$0xff] }
  0xc3   :  { %303 = vst [vmem:[%s896_s3 + $0xc8] sm:$0xff] %v239_v63  ;;  %v121_v27 = vmul.f32 %v374_v1, %v53_v16 }
  0xc5   :  { %v189_v42 = vadd.f32 %v379_v2, %v121_v27 }
  0xc7   :  { %v253_v57 = vmax.f32 %v189_v42, 0.0 }
  0xca   :  { %v54_v20 = vld [vmem:[%s893_s0 + $0x140] sm:$0xff] }
  0xcb   :  { %304 = vst [vmem:[%s896_s3 + $0xd0] sm:$0xff] %v240_v5  ;;  %v122_v31 = vmul.f32 %v374_v1, %v54_v20 }
  0xcd   :  { %v190_v46 = vadd.f32 %v379_v2, %v122_v31 }
  0xcf   :  { %v254_v61 = vmax.f32 %v190_v46, 0.0 }
  0xd2   :  { %v55_v24 = vld [vmem:[%s893_s0 + $0x148] sm:$0xff] }
  0xd3   :  { %305 = vst [vmem:[%s896_s3 + $0xd8] sm:$0xff] %v241_v9  ;;  %v123_v35 = vmul.f32 %v374_v1, %v55_v24 }
  0xd5   :  { %v191_v50 = vadd.f32 %v379_v2, %v123_v35 }
  0xd7   :  { %v255_v4 = vmax.f32 %v191_v50, 0.0 }
  0xda   :  { %v56_v28 = vld [vmem:[%s893_s0 + $0x150] sm:$0xff] }
  0xdb   :  { %306 = vst [vmem:[%s896_s3 + $0xe0] sm:$0xff] %v242_v13  ;;  %v124_v39 = vmul.f32 %v374_v1, %v56_v28 }
  0xdd   :  { %v192_v54 = vadd.f32 %v379_v2, %v124_v39 }
  0xdf   :  { %v256_v8 = vmax.f32 %v192_v54, 0.0 }
  0xe2   :  { %v57_v32 = vld [vmem:[%s893_s0 + $0x158] sm:$0xff] }
  0xe3   :  { %307 = vst [vmem:[%s896_s3 + $0xe8] sm:$0xff] %v243_v17  ;;  %v125_v43 = vmul.f32 %v374_v1, %v57_v32 }
  0xe5   :  { %v193_v58 = vadd.f32 %v379_v2, %v125_v43 }
  0xe7   :  { %v257_v12 = vmax.f32 %v193_v58, 0.0 }
  0xea   :  { %v58_v36 = vld [vmem:[%s893_s0 + $0x160] sm:$0xff] }
  0xeb   :  { %308 = vst [vmem:[%s896_s3 + $0xf0] sm:$0xff] %v244_v21  ;;  %v126_v47 = vmul.f32 %v374_v1, %v58_v36 }
  0xed   :  { %v194_v62 = vadd.f32 %v379_v2, %v126_v47 }
  0xef   :  { %v258_v17 = vmax.f32 %v194_v62, 0.0 }
  0xf2   :  { %v59_v40 = vld [vmem:[%s893_s0 + $0x168] sm:$0xff] }
  0xf3   :  { %309 = vst [vmem:[%s896_s3 + $0xf8] sm:$0xff] %v245_v25  ;;  %v127_v51 = vmul.f32 %v374_v1, %v59_v40 }
  0xf5   :  { %v195_v5 = vadd.f32 %v379_v2, %v127_v51 }
  0xf7   :  { %v259_v21 = vmax.f32 %v195_v5, 0.0 }
  0xfa   :  { %v60_v44 = vld [vmem:[%s893_s0 + $0x170] sm:$0xff] }
  0xfb   :  { %310 = vst [vmem:[%s896_s3 + $0x100] sm:$0xff] %v246_v29  ;;  %v128_v55 = vmul.f32 %v374_v1, %v60_v44 }
  0xfd   :  { %v196_v9 = vadd.f32 %v379_v2, %v128_v55 }
  0xff   :  { %v260_v26 = vmax.f32 %v196_v9, 0.0 }
 0x102   :  { %v61_v48 = vld [vmem:[%s893_s0 + $0x178] sm:$0xff] }
 0x103   :  { %311 = vst [vmem:[%s896_s3 + $0x108] sm:$0xff] %v247_v33  ;;  %v129_v59 = vmul.f32 %v374_v1, %v61_v48 }
 0x105   :  { %v197_v13 = vadd.f32 %v379_v2, %v129_v59 }
 0x107   :  { %v261_v30 = vmax.f32 %v197_v13, 0.0 }
 0x10a   :  { %v62_v52 = vld [vmem:[%s893_s0 + $0x180] sm:$0xff] }
 0x10b   :  { %312 = vst [vmem:[%s896_s3 + $0x110] sm:$0xff] %v248_v37  ;;  %v130_v63 = vmul.f32 %v374_v1, %v62_v52 }
 0x10d   :  { %v198_v18 = vadd.f32 %v379_v2, %v130_v63 }
 0x10f   :  { %v262_v34 = vmax.f32 %v198_v18, 0.0 }
 0x112   :  { %v63_v56 = vld [vmem:[%s893_s0 + $0x188] sm:$0xff] }
 0x113   :  { %313 = vst [vmem:[%s896_s3 + $0x118] sm:$0xff] %v249_v41  ;;  %v131_v6 = vmul.f32 %v374_v1, %v63_v56 }
 0x115   :  { %v199_v22 = vadd.f32 %v379_v2, %v131_v6 }
 0x117   :  { %v263_v38 = vmax.f32 %v199_v22, 0.0 }
 0x11a   :  { %v64_v60 = vld [vmem:[%s893_s0 + $0x190] sm:$0xff] }
 0x11b   :  { %314 = vst [vmem:[%s896_s3 + $0x120] sm:$0xff] %v250_v45  ;;  %v132_v10 = vmul.f32 %v374_v1, %v64_v60 }
 0x11d   :  { %v200_v27 = vadd.f32 %v379_v2, %v132_v10 }
 0x11f   :  { %v264_v42 = vmax.f32 %v200_v27, 0.0 }
 0x122   :  { %v65_v0 = vld [vmem:[%s893_s0 + $0x198] sm:$0xff] }
 0x123   :  { %v77_v3 = vld [vmem:[%s893_s0 + $0x1f8] sm:$0xff]  ;;  %v133_v14 = vmul.f32 %v374_v1, %v65_v0 }
 0x124   :  { %315 = vst [vmem:[%s896_s3 + $0x128] sm:$0xff] %v251_v49  ;;  %v145_v16 = vmul.f32 %v374_v1, %v77_v3 }
 0x125   :  { %v201_v31 = vadd.f32 %v379_v2, %v133_v14 }
 0x126   :  { %v784_v25 = vadd.f32 %v379_v2, %v145_v16 }
 0x127   :  { %v265_v46 = vmax.f32 %v201_v31, 0.0 }
 0x12b   :  { %v66_v7 = vld [vmem:[%s893_s0 + $0x1a0] sm:$0xff] }
 0x12c   :  { %316 = vst [vmem:[%s896_s3 + $0x130] sm:$0xff] %v252_v53  ;;  %v134_v19 = vmul.f32 %v374_v1, %v66_v7  ;;  %v277_v7 = vmax.f32 %v784_v25, 0.0 }
 0x12e   :  { %v202_v35 = vadd.f32 %v379_v2, %v134_v19 }
 0x130   :  { %v266_v50 = vmax.f32 %v202_v35, 0.0 }
 0x133   :  { %v67_v11 = vld [vmem:[%s893_s0 + $0x1a8] sm:$0xff] }
 0x134   :  { %317 = vst [vmem:[%s896_s3 + $0x138] sm:$0xff] %v253_v57  ;;  %v135_v23 = vmul.f32 %v374_v1, %v67_v11 }
 0x136   :  { %v203_v39 = vadd.f32 %v379_v2, %v135_v23 }
 0x138   :  { %v267_v53 = vmax.f32 %v203_v39, 0.0 }
 0x13b   :  { %v68_v15 = vld [vmem:[%s893_s0 + $0x1b0] sm:$0xff] }
 0x13c   :  { %318 = vst [vmem:[%s896_s3 + $0x140] sm:$0xff] %v254_v61  ;;  %v136_v28 = vmul.f32 %v374_v1, %v68_v15 }
 0x13e   :  { %v204_v43 = vadd.f32 %v379_v2, %v136_v28 }
 0x140   :  { %v268_v56 = vmax.f32 %v204_v43, 0.0 }
 0x143   :  { %v69_v20 = vld [vmem:[%s893_s0 + $0x1b8] sm:$0xff] }
 0x144   :  { %319 = vst [vmem:[%s896_s3 + $0x148] sm:$0xff] %v255_v4  ;;  %v137_v32 = vmul.f32 %v374_v1, %v69_v20 }
 0x146   :  { %v205_v47 = vadd.f32 %v379_v2, %v137_v32 }
 0x148   :  { %v269_v59 = vmax.f32 %v205_v47, 0.0 }
 0x14b   :  { %v70_v24 = vld [vmem:[%s893_s0 + $0x1c0] sm:$0xff] }
 0x14c   :  { %320 = vst [vmem:[%s896_s3 + $0x150] sm:$0xff] %v256_v8  ;;  %v138_v36 = vmul.f32 %v374_v1, %v70_v24 }
 0x14e   :  { %v206_v51 = vadd.f32 %v379_v2, %v138_v36 }
 0x150   :  { %v270_v61 = vmax.f32 %v206_v51, 0.0 }
 0x153   :  { %v71_v29 = vld [vmem:[%s893_s0 + $0x1c8] sm:$0xff] }
 0x154   :  { %321 = vst [vmem:[%s896_s3 + $0x158] sm:$0xff] %v257_v12  ;;  %v139_v40 = vmul.f32 %v374_v1, %v71_v29 }
 0x156   :  { %v207_v54 = vadd.f32 %v379_v2, %v139_v40 }
 0x158   :  { %v271_v63 = vmax.f32 %v207_v54, 0.0 }
 0x15b   :  { %v72_v33 = vld [vmem:[%s893_s0 + $0x1d0] sm:$0xff] }
 0x15c   :  { %322 = vst [vmem:[%s896_s3 + $0x160] sm:$0xff] %v258_v17  ;;  %v140_v44 = vmul.f32 %v374_v1, %v72_v33 }
 0x15e   :  { %v208_v57 = vadd.f32 %v379_v2, %v140_v44 }
 0x160   :  { %v272_v0 = vmax.f32 %v208_v57, 0.0 }
 0x163   :  { %v73_v37 = vld [vmem:[%s893_s0 + $0x1d8] sm:$0xff] }
 0x164   :  { %323 = vst [vmem:[%s896_s3 + $0x168] sm:$0xff] %v259_v21  ;;  %v141_v48 = vmul.f32 %v374_v1, %v73_v37 }
 0x166   :  { %v209_v60 = vadd.f32 %v379_v2, %v141_v48 }
 0x168   :  { %v273_v4 = vmax.f32 %v209_v60, 0.0 }
 0x16b   :  { %v74_v41 = vld [vmem:[%s893_s0 + $0x1e0] sm:$0xff] }
 0x16c   :  { %324 = vst [vmem:[%s896_s3 + $0x170] sm:$0xff] %v260_v26  ;;  %v142_v52 = vmul.f32 %v374_v1, %v74_v41 }
 0x16e   :  { %v210_v62 = vadd.f32 %v379_v2, %v142_v52 }
 0x170   :  { %v274_v5 = vmax.f32 %v210_v62, 0.0 }
 0x173   :  { %v75_v45 = vld [vmem:[%s893_s0 + $0x1e8] sm:$0xff] }
 0x174   :  { %325 = vst [vmem:[%s896_s3 + $0x178] sm:$0xff] %v261_v30  ;;  %v143_v55 = vmul.f32 %v374_v1, %v75_v45 }
 0x17b   :  { %v76_v49 = vld [vmem:[%s893_s0 + $0x1f0] sm:$0xff] }
 0x17c   :  { %326 = vst [vmem:[%s896_s3 + $0x180] sm:$0xff] %v262_v34  ;;  %v144_v58 = vmul.f32 %v374_v1, %v76_v49  ;;  %v211_v1 = vadd.f32 %v379_v2, %v143_v55 }
 0x17d   :  { %327 = vst [vmem:[%s896_s3 + $0x188] sm:$0xff] %v263_v38 }
 0x17e   :  { %328 = vst [vmem:[%s896_s3 + $0x190] sm:$0xff] %v264_v42  ;;  %v212_v3 = vadd.f32 %v379_v2, %v144_v58  ;;  %v275_v6 = vmax.f32 %v211_v1, 0.0 }
 0x17f   :  { %329 = vst [vmem:[%s896_s3 + $0x198] sm:$0xff] %v265_v46 }
 0x180   :  { %330 = vst [vmem:[%s896_s3 + $0x1a0] sm:$0xff] %v266_v50  ;;  %v276_v2 = vmax.f32 %v212_v3, 0.0 }
 0x181   :  { %331 = vst [vmem:[%s896_s3 + $0x1a8] sm:$0xff] %v267_v53 }
 0x182   :  { %332 = vst [vmem:[%s896_s3 + $0x1b0] sm:$0xff] %v268_v56 }
 0x183   :  { %333 = vst [vmem:[%s896_s3 + $0x1b8] sm:$0xff] %v269_v59 }
 0x184   :  { %334 = vst [vmem:[%s896_s3 + $0x1c0] sm:$0xff] %v270_v61 }
 0x185   :  { %335 = vst [vmem:[%s896_s3 + $0x1c8] sm:$0xff] %v271_v63 }
 0x186   :  { %336 = vst [vmem:[%s896_s3 + $0x1d0] sm:$0xff] %v272_v0 }
 0x187   :  { %337 = vst [vmem:[%s896_s3 + $0x1d8] sm:$0xff] %v273_v4 }
 0x188   :  { %338 = vst [vmem:[%s896_s3 + $0x1e0] sm:$0xff] %v274_v5 }
 0x189   :  { %339 = vst [vmem:[%s896_s3 + $0x1e8] sm:$0xff] %v275_v6 }
 0x18a   :  { %340 = vst [vmem:[%s896_s3 + $0x1f0] sm:$0xff] %v276_v2 }
 0x18b   :  { %341 = vst [vmem:[%s896_s3 + $0x1f8] sm:$0xff] %v277_v7 }

// kernel: conv_norm_relu.2
= control target key start
LH: loop header
LB: loop body
LE: loop exit
PB: predicated region body
PF: predicated region fallthrough
CT: control target
= control target key end

     0   :  { %s1470_s1 = inlined_call_operand.vmem [shape: f32[128,128], index: 1, kind: input, shape index: {}]   ;;  %s1471_s0 = inlined_call_operand.vmem [shape: f32[512,128], index: 0, kind: input, shape index: {}]   ;;  %s1472_s2 = inlined_call_operand.vmem [shape: f32[512,128], index: 2, kind: output, shape index: {0}]   ;;  %s1473_s3 = inlined_call_operand.vmem [shape: f32[1,1,128], index: 3, kind: output, shape index: {1}]   ;;  %s1474_s4 = inlined_call_operand.vmem [shape: f32[1,1,128], index: 4, kind: output, shape index: {2}]  }
   0x1   :  { %v135_v0 = vld [vmem:[%s1470_s1 + $0x78] sm:$0xff]  ;;  %v134_v1 = vld [vmem:[%s1470_s1 + $0x70] sm:$0xff]  ;;  %v133_v2 = vld [vmem:[%s1470_s1 + $0x68] sm:$0xff] }
   0x2   :  { %136 = vmatpush.msra.mxu0 %v135_v0  ;;  %657 = vmatpush.msra.mxu1 %v135_v0  ;;  %v132_v3 = vld [vmem:[%s1470_s1 + $0x60] sm:$0xff]  ;;  %v131_v4 = vld [vmem:[%s1470_s1 + $0x58] sm:$0xff]  ;;  %v130_v5 = vld [vmem:[%s1470_s1 + $0x50] sm:$0xff] }
   0x3   :  { %658 = vmatpush.msra.mxu2 %v135_v0  ;;  %659 = vmatpush.msra.mxu3 %v135_v0  ;;  %v129_v6 = vld [vmem:[%s1470_s1 + $0x48] sm:$0xff]  ;;  %v128_v7 = vld [vmem:[%s1470_s1 + $0x40] sm:$0xff]  ;;  %v127_v8 = vld [vmem:[%s1470_s1 + $0x38] sm:$0xff] }
   0x4   :  { %137 = vmatpush.msra.mxu0 %v134_v1  ;;  %660 = vmatpush.msra.mxu1 %v134_v1  ;;  %v126_v9 = vld [vmem:[%s1470_s1 + $0x30] sm:$0xff]  ;;  %v125_v10 = vld [vmem:[%s1470_s1 + $0x28] sm:$0xff]  ;;  %v124_v11 = vld [vmem:[%s1470_s1 + $0x20] sm:$0xff] }
   0x5   :  { %661 = vmatpush.msra.mxu2 %v134_v1  ;;  %662 = vmatpush.msra.mxu3 %v134_v1  ;;  %v123_v12 = vld [vmem:[%s1470_s1 + $0x18] sm:$0xff]  ;;  %v122_v13 = vld [vmem:[%s1470_s1 + $0x10] sm:$0xff]  ;;  %v121_v14 = vld [vmem:[%s1470_s1 + $0x8] sm:$0xff] }
   0x6   :  { %138 = vmatpush.msra.mxu0 %v133_v2  ;;  %663 = vmatpush.msra.mxu1 %v133_v2  ;;  %v120_v15 = vld [vmem:[%s1470_s1] sm:$0xff]  ;;  %v57_v18 = vld [vmem:[%s1471_s0 + $0x8] sm:$0xff]  ;;  %v58_v20 = vld [vmem:[%s1471_s0 + $0x10] sm:$0xff] }
   0x7   :  { %664 = vmatpush.msra.mxu2 %v133_v2  ;;  %665 = vmatpush.msra.mxu3 %v133_v2  ;;  %v56_v16 = vld [vmem:[%s1471_s0] sm:$0xff]  ;;  %v73_v19 = vld [vmem:[%s1471_s0 + $0x88] sm:$0xff]  ;;  %v74_v21 = vld [vmem:[%s1471_s0 + $0x90] sm:$0xff] }
   0x8   :  { %139 = vmatpush.msra.mxu0 %v132_v3  ;;  %666 = vmatpush.msra.mxu1 %v132_v3  ;;  %v72_v17 = vld [vmem:[%s1471_s0 + $0x80] sm:$0xff]  ;;  %v59_v22 = vld [vmem:[%s1471_s0 + $0x18] sm:$0xff]  ;;  %v89_v27 = vld [vmem:[%s1471_s0 + $0x108] sm:$0xff] }
   0x9   :  { %667 = vmatpush.msra.mxu2 %v132_v3  ;;  %668 = vmatpush.msra.mxu3 %v132_v3  ;;  %v75_v23 = vld [vmem:[%s1471_s0 + $0x98] sm:$0xff]  ;;  %v88_v24 = vld [vmem:[%s1471_s0 + $0x100] sm:$0xff]  ;;  %v61_v28 = vld [vmem:[%s1471_s0 + $0x28] sm:$0xff] }
   0xa   :  { %140 = vmatpush.msra.mxu0 %v131_v4  ;;  %669 = vmatpush.msra.mxu1 %v131_v4  ;;  %v60_v25 = vld [vmem:[%s1471_s0 + $0x20] sm:$0xff]  ;;  %v77_v29 = vld [vmem:[%s1471_s0 + $0xa8] sm:$0xff]  ;;  %v90_v30 = vld [vmem:[%s1471_s0 + $0x110] sm:$0xff] }
   0xb   :  { %670 = vmatpush.msra.mxu2 %v131_v4  ;;  %671 = vmatpush.msra.mxu3 %v131_v4  ;;  %v76_v26 = vld [vmem:[%s1471_s0 + $0xa0] sm:$0xff]  ;;  %v62_v31 = vld [vmem:[%s1471_s0 + $0x30] sm:$0xff]  ;;  %v91_v33 = vld [vmem:[%s1471_s0 + $0x118] sm:$0xff] }
   0xc   :  { %141 = vmatpush.msra.mxu0 %v130_v5  ;;  %672 = vmatpush.msra.mxu1 %v130_v5  ;;  %v78_v32 = vld [vmem:[%s1471_s0 + $0xb0] sm:$0xff]  ;;  %v63_v34 = vld [vmem:[%s1471_s0 + $0x38] sm:$0xff]  ;;  %v92_v36 = vld [vmem:[%s1471_s0 + $0x120] sm:$0xff] }
   0xd   :  { %673 = vmatpush.msra.mxu2 %v130_v5  ;;  %674 = vmatpush.msra.mxu3 %v130_v5  ;;  %v79_v35 = vld [vmem:[%s1471_s0 + $0xb8] sm:$0xff]  ;;  %v104_v37 = vld [vmem:[%s1471_s0 + $0x180] sm:$0xff]  ;;  %v93_v40 = vld [vmem:[%s1471_s0 + $0x128] sm:$0xff] }
   0xe   :  { %142 = vmatpush.msra.mxu0 %v129_v6  ;;  %675 = vmatpush.msra.mxu1 %v129_v6  ;;  %v64_v38 = vld [vmem:[%s1471_s0 + $0x40] sm:$0xff]  ;;  %v105_v41 = vld [vmem:[%s1471_s0 + $0x188] sm:$0xff]  ;;  %v94_v44 = vld [vmem:[%s1471_s0 + $0x130] sm:$0xff] }
   0xf   :  { %676 = vmatpush.msra.mxu2 %v129_v6  ;;  %677 = vmatpush.msra.mxu3 %v129_v6  ;;  %v80_v39 = vld [vmem:[%s1471_s0 + $0xc0] sm:$0xff]  ;;  %v65_v42 = vld [vmem:[%s1471_s0 + $0x48] sm:$0xff]  ;;  %v106_v45 = vld [vmem:[%s1471_s0 + $0x190] sm:$0xff] }
  0x10   :  { %143 = vmatpush.msra.mxu0 %v128_v7  ;;  %678 = vmatpush.msra.mxu1 %v128_v7  ;;  %v81_v43 = vld [vmem:[%s1471_s0 + $0xc8] sm:$0xff]  ;;  %v66_v46 = vld [vmem:[%s1471_s0 + $0x50] sm:$0xff]  ;;  %v95_v48 = vld [vmem:[%s1471_s0 + $0x138] sm:$0xff] }
  0x11   :  { %679 = vmatpush.msra.mxu2 %v128_v7  ;;  %680 = vmatpush.msra.mxu3 %v128_v7  ;;  %v82_v47 = vld [vmem:[%s1471_s0 + $0xd0] sm:$0xff]  ;;  %v107_v49 = vld [vmem:[%s1471_s0 + $0x198] sm:$0xff]  ;;  %v96_v52 = vld [vmem:[%s1471_s0 + $0x140] sm:$0xff] }
  0x12   :  { %144 = vmatpush.msra.mxu0 %v127_v8  ;;  %681 = vmatpush.msra.mxu1 %v127_v8  ;;  %v67_v50 = vld [vmem:[%s1471_s0 + $0x58] sm:$0xff]  ;;  %v108_v53 = vld [vmem:[%s1471_s0 + $0x1a0] sm:$0xff]  ;;  %v97_v56 = vld [vmem:[%s1471_s0 + $0x148] sm:$0xff] }
  0x13   :  { %682 = vmatpush.msra.mxu2 %v127_v8  ;;  %683 = vmatpush.msra.mxu3 %v127_v8  ;;  %v83_v51 = vld [vmem:[%s1471_s0 + $0xd8] sm:$0xff]  ;;  %v68_v54 = vld [vmem:[%s1471_s0 + $0x60] sm:$0xff]  ;;  %v109_v57 = vld [vmem:[%s1471_s0 + $0x1a8] sm:$0xff] }
  0x14   :  { %145 = vmatpush.msra.mxu0 %v126_v9  ;;  %684 = vmatpush.msra.mxu1 %v126_v9  ;;  %v84_v55 = vld [vmem:[%s1471_s0 + $0xe0] sm:$0xff]  ;;  %v69_v58 = vld [vmem:[%s1471_s0 + $0x68] sm:$0xff]  ;;  %v98_v60 = vld [vmem:[%s1471_s0 + $0x150] sm:$0xff] }
  0x15   :  { %685 = vmatpush.msra.mxu2 %v126_v9  ;;  %686 = vmatpush.msra.mxu3 %v126_v9  ;;  %v85_v59 = vld [vmem:[%s1471_s0 + $0xe8] sm:$0xff]  ;;  %v110_v61 = vld [vmem:[%s1471_s0 + $0x1b0] sm:$0xff]  ;;  %v99_v0 = vld [vmem:[%s1471_s0 + $0x158] sm:$0xff] }
  0x16   :  { %146 = vmatpush.msra.mxu0 %v125_v10  ;;  %687 = vmatpush.msra.mxu1 %v125_v10  ;;  %v70_v62 = vld [vmem:[%s1471_s0 + $0x70] sm:$0xff]  ;;  %v111_v1 = vld [vmem:[%s1471_s0 + $0x1b8] sm:$0xff]  ;;  %v100_v4 = vld [vmem:[%s1471_s0 + $0x160] sm:$0xff] }
  0x17   :  { %688 = vmatpush.msra.mxu2 %v125_v10  ;;  %689 = vmatpush.msra.mxu3 %v125_v10  ;;  %v86_v63 = vld [vmem:[%s1471_s0 + $0xf0] sm:$0xff]  ;;  %v71_v2 = vld [vmem:[%s1471_s0 + $0x78] sm:$0xff]  ;;  %v112_v5 = vld [vmem:[%s1471_s0 + $0x1c0] sm:$0xff] }
  0x18   :  { %147 = vmatpush.msra.mxu0 %v124_v11  ;;  %690 = vmatpush.msra.mxu1 %v124_v11  ;;  %v87_v3 = vld [vmem:[%s1471_s0 + $0xf8] sm:$0xff]  ;;  %v101_v8 = vld [vmem:[%s1471_s0 + $0x168] sm:$0xff] }
  0x19   :  { %691 = vmatpush.msra.mxu2 %v124_v11  ;;  %692 = vmatpush.msra.mxu3 %v124_v11  ;;  %v113_v9 = vld [vmem:[%s1471_s0 + $0x1c8] sm:$0xff] }
  0x1a   :  { %148 = vmatpush.msra.mxu0 %v123_v12  ;;  %693 = vmatpush.msra.mxu1 %v123_v12 }
  0x1b   :  { %694 = vmatpush.msra.mxu2 %v123_v12  ;;  %695 = vmatpush.msra.mxu3 %v123_v12 }
  0x1c   :  { %149 = vmatpush.msra.mxu0 %v122_v13  ;;  %696 = vmatpush.msra.mxu1 %v122_v13 }
  0x1d   :  { %697 = vmatpush.msra.mxu2 %v122_v13  ;;  %698 = vmatpush.msra.mxu3 %v122_v13 }
  0x1e   :  { %150 = vmatpush.msra.mxu0 %v121_v14  ;;  %699 = vmatpush.msra.mxu1 %v121_v14 }
  0x1f   :  { %700 = vmatpush.msra.mxu2 %v121_v14  ;;  %701 = vmatpush.msra.mxu3 %v121_v14 }
  0x20   :  { %151 = vmatpush.msra.mxu0 %v120_v15  ;;  %702 = vmatpush.msra.mxu1 %v120_v15 }
  0x21   :  { %152 = vmatmul.f32.vlgmr.msra.gmra.mxu0 %v56_v16  ;;  %200 = vmatmul.f32.vlgmr.msra.gmra.mxu1 %v72_v17  ;;  %v102_v16 = vld [vmem:[%s1471_s0 + $0x170] sm:$0xff] }
  0x22   :  { %703 = vmatpush.msra.mxu2 %v120_v15  ;;  %704 = vmatpush.msra.mxu3 %v120_v15  ;;  %v114_v17 = vld [vmem:[%s1471_s0 + $0x1d0] sm:$0xff] }
  0x23   :  { %248 = vmatmul.f32.vlgmr.msra.gmra.mxu2 %v88_v24  ;;  %296 = vmatmul.f32.vlgmr.msra.gmra.mxu3 %v104_v37  ;;  %v115_v24 = vld [vmem:[%s1471_s0 + $0x1d8] sm:$0xff]  ;;  %v117_v37 = vld [vmem:[%s1471_s0 + $0x1e8] sm:$0xff] }
  0x29   :  { %155 = vmatmul.f32.gmra.mxu0 %v57_v18  ;;  %203 = vmatmul.f32.gmra.mxu1 %v73_v19 }
  0x2b   :  { %251 = vmatmul.f32.gmra.mxu2 %v89_v27  ;;  %299 = vmatmul.f32.gmra.mxu3 %v105_v41  ;;  %v118_v41 = vld [vmem:[%s1471_s0 + $0x1f0] sm:$0xff] }
  0x31   :  { %158 = vmatmul.f32.gmra.mxu0 %v58_v20  ;;  %206 = vmatmul.f32.gmra.mxu1 %v74_v21 }
  0x33   :  { %254 = vmatmul.f32.gmra.mxu2 %v90_v30  ;;  %302 = vmatmul.f32.gmra.mxu3 %v106_v45  ;;  %v116_v30 = vld [vmem:[%s1471_s0 + $0x1e0] sm:$0xff]  ;;  %v119_v45 = vld [vmem:[%s1471_s0 + $0x1f8] sm:$0xff] }
  0x39   :  { %161 = vmatmul.f32.gmra.mxu0 %v59_v22  ;;  %209 = vmatmul.f32.gmra.mxu1 %v75_v23  ;;  %v103_v23 = vld [vmem:[%s1471_s0 + $0x178] sm:$0xff] }
  0x3b   :  { %257 = vmatmul.f32.gmra.mxu2 %v91_v33  ;;  %305 = vmatmul.f32.gmra.mxu3 %v107_v49 }
  0x41   :  { %164 = vmatmul.f32.gmra.mxu0 %v60_v25  ;;  %212 = vmatmul.f32.gmra.mxu1 %v76_v26 }
  0x43   :  { %260 = vmatmul.f32.gmra.mxu2 %v92_v36  ;;  %308 = vmatmul.f32.gmra.mxu3 %v108_v53 }
  0x49   :  { %167 = vmatmul.f32.gmra.mxu0 %v61_v28  ;;  %215 = vmatmul.f32.gmra.mxu1 %v77_v29 }
  0x4b   :  { %263 = vmatmul.f32.gmra.mxu2 %v93_v40  ;;  %311 = vmatmul.f32.gmra.mxu3 %v109_v57 }
  0x51   :  { %170 = vmatmul.f32.gmra.mxu0 %v62_v31  ;;  %218 = vmatmul.f32.gmra.mxu1 %v78_v32 }
  0x53   :  { %266 = vmatmul.f32.gmra.mxu2 %v94_v44  ;;  %314 = vmatmul.f32.gmra.mxu3 %v110_v61 }
  0x59   :  { %173 = vmatmul.f32.gmra.mxu0 %v63_v34  ;;  %221 = vmatmul.f32.gmra.mxu1 %v79_v35 }
  0x5b   :  { %269 = vmatmul.f32.gmra.mxu2 %v95_v48  ;;  %317 = vmatmul.f32.gmra.mxu3 %v111_v1 }
  0x61   :  { %176 = vmatmul.f32.gmra.mxu0 %v64_v38  ;;  %224 = vmatmul.f32.gmra.mxu1 %v80_v39 }
  0x63   :  { %272 = vmatmul.f32.gmra.mxu2 %v96_v52  ;;  %320 = vmatmul.f32.gmra.mxu3 %v112_v5 }
  0x69   :  { %179 = vmatmul.f32.gmra.mxu0 %v65_v42  ;;  %227 = vmatmul.f32.gmra.mxu1 %v81_v43 }
  0x6b   :  { %275 = vmatmul.f32.gmra.mxu2 %v97_v56  ;;  %323 = vmatmul.f32.gmra.mxu3 %v113_v9 }
  0x71   :  { %182 = vmatmul.f32.gmra.mxu0 %v66_v46  ;;  %230 = vmatmul.f32.gmra.mxu1 %v82_v47 }
  0x73   :  { %278 = vmatmul.f32.gmra.mxu2 %v98_v60  ;;  %326 = vmatmul.f32.gmra.mxu3 %v114_v17 }
  0x79   :  { %185 = vmatmul.f32.gmra.mxu0 %v67_v50  ;;  %233 = vmatmul.f32.gmra.mxu1 %v83_v51 }
  0x7b   :  { %281 = vmatmul.f32.gmra.mxu2 %v99_v0  ;;  %329 = vmatmul.f32.gmra.mxu3 %v115_v24 }
  0x81   :  { %188 = vmatmul.f32.gmra.mxu0 %v68_v54  ;;  %236 = vmatmul.f32.gmra.mxu1 %v84_v55 }
  0x83   :  { %284 = vmatmul.f32.gmra.mxu2 %v100_v4  ;;  %332 = vmatmul.f32.gmra.mxu3 %v116_v30 }
  0x89   :  { %191 = vmatmul.f32.gmra.mxu0 %v69_v58  ;;  %239 = vmatmul.f32.gmra.mxu1 %v85_v59 }
  0x8b   :  { %287 = vmatmul.f32.gmra.mxu2 %v101_v8  ;;  %335 = vmatmul.f32.gmra.mxu3 %v117_v37 }
  0x91   :  { %194 = vmatmul.f32.gmra.mxu0 %v70_v62  ;;  %242 = vmatmul.f32.gmra.mxu1 %v86_v63 }
  0x93   :  { %290 = vmatmul.f32.gmra.mxu2 %v102_v16  ;;  %338 = vmatmul.f32.gmra.mxu3 %v118_v41 }
  0x99   :  { %197 = vmatmul.f32.gmra.mxu0 %v71_v2  ;;  %245 = vmatmul.f32.gmra.mxu1 %v87_v3 }
  0x9b   :  { %293 = vmatmul.f32.gmra.mxu2 %v103_v23  ;;  %341 = vmatmul.f32.gmra.mxu3 %v119_v45 }
  0x9e   :  { %v153_v6 = vpop.f32.mrf.mxu0  ;;  %v942_v7 = vpop.f32.mrf.mxu1 }
  0x9f   :  { %553 = vst [vmem:[%s1472_s2] sm:$0xff] %v153_v6  ;;  %v418_v12 = vmul.f32 %v153_v6, %v153_v6 }
  0xa0   :  { %569 = vst [vmem:[%s1472_s2 + $0x80] sm:$0xff] %v942_v7 }
  0xa6   :  { %v156_v10 = vpop.f32.mrf.mxu0  ;;  %v957_v11 = vpop.f32.mrf.mxu1 }
  0xa7   :  { %v346_v13 = vadd.f32 %v156_v10, %v153_v6  ;;  %v419_v14 = vmul.f32 %v156_v10, %v156_v10  ;;  %554 = vst [vmem:[%s1472_s2 + $0x8] sm:$0xff] %v156_v10  ;;  %v1006_v35 = vpop.f32.mrf.mxu2  ;;  %v1082_v52 = vpop.f32.mrf.mxu3 }
  0xa8   :  { %570 = vst [vmem:[%s1472_s2 + $0x88] sm:$0xff] %v957_v11 }
  0xa9   :  { %v482_v15 = vadd.f32 %v419_v14, %v418_v12  ;;  %585 = vst [vmem:[%s1472_s2 + $0x100] sm:$0xff] %v1006_v35 }
  0xaa   :  { %601 = vst [vmem:[%s1472_s2 + $0x180] sm:$0xff] %v1082_v52 }
  0xae   :  { %v159_v18 = vpop.f32.mrf.mxu0  ;;  %v972_v19 = vpop.f32.mrf.mxu1 }
  0xaf   :  { %v347_v20 = vadd.f32 %v346_v13, %v159_v18  ;;  %v420_v21 = vmul.f32 %v159_v18, %v159_v18  ;;  %555 = vst [vmem:[%s1472_s2 + $0x10] sm:$0xff] %v159_v18  ;;  %v1029_v40 = vpop.f32.mrf.mxu2  ;;  %v1103_v56 = vpop.f32.mrf.mxu3 }
  0xb0   :  { %571 = vst [vmem:[%s1472_s2 + $0x90] sm:$0xff] %v972_v19 }
  0xb1   :  { %v483_v22 = vadd.f32 %v482_v15, %v420_v21  ;;  %586 = vst [vmem:[%s1472_s2 + $0x108] sm:$0xff] %v1029_v40 }
  0xb2   :  { %602 = vst [vmem:[%s1472_s2 + $0x188] sm:$0xff] %v1103_v56 }
  0xb6   :  { %v162_v25 = vpop.f32.mrf.mxu0  ;;  %v987_v26 = vpop.f32.mrf.mxu1 }
  0xb7   :  { %v348_v27 = vadd.f32 %v347_v20, %v162_v25  ;;  %v421_v28 = vmul.f32 %v162_v25, %v162_v25  ;;  %556 = vst [vmem:[%s1472_s2 + $0x18] sm:$0xff] %v162_v25  ;;  %v1047_v44 = vpop.f32.mrf.mxu2  ;;  %v1124_v60 = vpop.f32.mrf.mxu3 }
  0xb8   :  { %572 = vst [vmem:[%s1472_s2 + $0x98] sm:$0xff] %v987_v26 }
  0xb9   :  { %v484_v29 = vadd.f32 %v483_v22, %v421_v28  ;;  %587 = vst [vmem:[%s1472_s2 + $0x110] sm:$0xff] %v1047_v44 }
  0xba   :  { %603 = vst [vmem:[%s1472_s2 + $0x190] sm:$0xff] %v1124_v60 }
  0xbe   :  { %v165_v31 = vpop.f32.mrf.mxu0  ;;  %v999_v32 = vpop.f32.mrf.mxu1 }
  0xbf   :  { %v1001_v33 = vadd.f32 %v348_v27, %v165_v31  ;;  %v422_v34 = vmul.f32 %v165_v31, %v165_v31  ;;  %557 = vst [vmem:[%s1472_s2 + $0x20] sm:$0xff] %v165_v31  ;;  %v1065_v48 = vpop.f32.mrf.mxu2  ;;  %v1145_v0 = vpop.f32.mrf.mxu3 }
  0xc0   :  { %573 = vst [vmem:[%s1472_s2 + $0xa0] sm:$0xff] %v999_v32 }
  0xc1   :  { %v1012_v36 = vadd.f32 %v484_v29, %v422_v34  ;;  %588 = vst [vmem:[%s1472_s2 + $0x118] sm:$0xff] %v1065_v48 }
  0xc2   :  { %604 = vst [vmem:[%s1472_s2 + $0x198] sm:$0xff] %v1145_v0 }
  0xc6   :  { %v1021_v38 = vpop.f32.mrf.mxu0  ;;  %v1023_v39 = vpop.f32.mrf.mxu1 }
  0xc7   :  { %558 = vst [vmem:[%s1472_s2 + $0x28] sm:$0xff] %v1021_v38  ;;  %v1080_v51 = vpop.f32.mrf.mxu2  ;;  %v1166_v4 = vpop.f32.mrf.mxu3  ;;  %v423_v5 = vmul.f32 %v1021_v38, %v1021_v38  ;;  %v350_v6 = vadd.f32 %v1001_v33, %v1021_v38 }
  0xc8   :  { %574 = vst [vmem:[%s1472_s2 + $0xa8] sm:$0xff] %v1023_v39 }
  0xc9   :  { %589 = vst [vmem:[%s1472_s2 + $0x120] sm:$0xff] %v1080_v51  ;;  %v486_v9 = vadd.f32 %v1012_v36, %v423_v5 }
  0xca   :  { %605 = vst [vmem:[%s1472_s2 + $0x1a0] sm:$0xff] %v1166_v4 }
  0xce   :  { %v171_v42 = vpop.f32.mrf.mxu0  ;;  %v1042_v43 = vpop.f32.mrf.mxu1 }
  0xcf   :  { %559 = vst [vmem:[%s1472_s2 + $0x30] sm:$0xff] %v171_v42  ;;  %v1101_v55 = vpop.f32.mrf.mxu2  ;;  %v424_v8 = vmul.f32 %v171_v42, %v171_v42  ;;  %v351_v10 = vadd.f32 %v350_v6, %v171_v42  ;;  %v1192_v20 = vpop.f32.mrf.mxu3 }
  0xd0   :  { %575 = vst [vmem:[%s1472_s2 + $0xb0] sm:$0xff] %v1042_v43 }
  0xd1   :  { %590 = vst [vmem:[%s1472_s2 + $0x128] sm:$0xff] %v1101_v55  ;;  %v487_v15 = vadd.f32 %v486_v9, %v424_v8 }
  0xd2   :  { %606 = vst [vmem:[%s1472_s2 + $0x1a8] sm:$0xff] %v1192_v20 }
  0xd6   :  { %v174_v46 = vpop.f32.mrf.mxu0  ;;  %v1060_v47 = vpop.f32.mrf.mxu1 }
  0xd7   :  { %560 = vst [vmem:[%s1472_s2 + $0x38] sm:$0xff] %v174_v46  ;;  %v1122_v59 = vpop.f32.mrf.mxu2  ;;  %v425_v12 = vmul.f32 %v174_v46, %v174_v46  ;;  %v352_v16 = vadd.f32 %v351_v10, %v174_v46  ;;  %v1213_v41 = vpop.f32.mrf.mxu3 }
  0xd8   :  { %576 = vst [vmem:[%s1472_s2 + $0xb8] sm:$0xff] %v1060_v47 }
  0xd9   :  { %591 = vst [vmem:[%s1472_s2 + $0x130] sm:$0xff] %v1122_v59  ;;  %v488_v21 = vadd.f32 %v487_v15, %v425_v12 }
  0xda   :  { %607 = vst [vmem:[%s1472_s2 + $0x1b0] sm:$0xff] %v1213_v41 }
  0xde   :  { %v177_v49 = vpop.f32.mrf.mxu0  ;;  %v1075_v50 = vpop.f32.mrf.mxu1 }
  0xdf   :  { %561 = vst [vmem:[%s1472_s2 + $0x40] sm:$0xff] %v177_v49  ;;  %v1143_v63 = vpop.f32.mrf.mxu2  ;;  %v426_v17 = vmul.f32 %v177_v49, %v177_v49  ;;  %v353_v22 = vadd.f32 %v352_v16, %v177_v49  ;;  %v1234_v15 = vpop.f32.mrf.mxu3 }
  0xe0   :  { %577 = vst [vmem:[%s1472_s2 + $0xc0] sm:$0xff] %v1075_v50 }
  0xe1   :  { %592 = vst [vmem:[%s1472_s2 + $0x138] sm:$0xff] %v1143_v63  ;;  %v489_v24 = vadd.f32 %v488_v21, %v426_v17  ;;  %v435_v21 = vmul.f32 %v957_v11, %v957_v11 }
  0xe2   :  { %608 = vst [vmem:[%s1472_s2 + $0x1b8] sm:$0xff] %v1234_v15 }
  0xe6   :  { %v180_v53 = vpop.f32.mrf.mxu0  ;;  %v1096_v54 = vpop.f32.mrf.mxu1 }
  0xe7   :  { %562 = vst [vmem:[%s1472_s2 + $0x48] sm:$0xff] %v180_v53  ;;  %v1164_v3 = vpop.f32.mrf.mxu2  ;;  %v427_v23 = vmul.f32 %v180_v53, %v180_v53  ;;  %v354_v25 = vadd.f32 %v353_v22, %v180_v53 }
  0xe8   :  { %578 = vst [vmem:[%s1472_s2 + $0xc8] sm:$0xff] %v1096_v54 }
  0xe9   :  { %593 = vst [vmem:[%s1472_s2 + $0x140] sm:$0xff] %v1164_v3  ;;  %v490_v28 = vadd.f32 %v489_v24, %v427_v23 }
  0xee   :  { %v183_v57 = vpop.f32.mrf.mxu0  ;;  %v1117_v58 = vpop.f32.mrf.mxu1 }
  0xef   :  { %563 = vst [vmem:[%s1472_s2 + $0x50] sm:$0xff] %v183_v57  ;;  %v1190_v18 = vpop.f32.mrf.mxu2  ;;  %v428_v27 = vmul.f32 %v183_v57, %v183_v57  ;;  %v355_v29 = vadd.f32 %v354_v25, %v183_v57 }
  0xf0   :  { %579 = vst [vmem:[%s1472_s2 + $0xd0] sm:$0xff] %v1117_v58 }
  0xf1   :  { %594 = vst [vmem:[%s1472_s2 + $0x148] sm:$0xff] %v1190_v18  ;;  %v491_v34 = vadd.f32 %v490_v28, %v428_v27  ;;  %v437_v27 = vmul.f32 %v987_v26, %v987_v26 }
  0xf6   :  { %v186_v61 = vpop.f32.mrf.mxu0  ;;  %v1138_v62 = vpop.f32.mrf.mxu1 }
  0xf7   :  { %564 = vst [vmem:[%s1472_s2 + $0x58] sm:$0xff] %v186_v61  ;;  %v429_v30 = vmul.f32 %v186_v61, %v186_v61  ;;  %v356_v36 = vadd.f32 %v355_v29, %v186_v61  ;;  %v1211_v38 = vpop.f32.mrf.mxu2 }
  0xf8   :  { %580 = vst [vmem:[%s1472_s2 + $0xd8] sm:$0xff] %v1138_v62 }
  0xf9   :  { %v492_v42 = vadd.f32 %v491_v34, %v429_v30  ;;  %595 = vst [vmem:[%s1472_s2 + $0x150] sm:$0xff] %v1211_v38 }
  0xfe   :  { %v189_v1 = vpop.f32.mrf.mxu0  ;;  %v1159_v2 = vpop.f32.mrf.mxu1 }
  0xff   :  { %565 = vst [vmem:[%s1472_s2 + $0x60] sm:$0xff] %v189_v1  ;;  %v430_v37 = vmul.f32 %v189_v1, %v189_v1  ;;  %v357_v45 = vadd.f32 %v356_v36, %v189_v1  ;;  %v1232_v12 = vpop.f32.mrf.mxu2 }
 0x100   :  { %581 = vst [vmem:[%s1472_s2 + $0xe0] sm:$0xff] %v1159_v2 }
 0x101   :  { %v493_v49 = vadd.f32 %v492_v42, %v430_v37  ;;  %596 = vst [vmem:[%s1472_s2 + $0x158] sm:$0xff] %v1232_v12  ;;  %v440_v42 = vmul.f32 %v1042_v43, %v1042_v43 }
 0x106   :  { %v192_v13 = vpop.f32.mrf.mxu0  ;;  %v1185_v14 = vpop.f32.mrf.mxu1 }
 0x107   :  { %566 = vst [vmem:[%s1472_s2 + $0x68] sm:$0xff] %v192_v13  ;;  %v431_v46 = vmul.f32 %v192_v13, %v192_v13  ;;  %v358_v53 = vadd.f32 %v357_v45, %v192_v13  ;;  %v434_v13 = vmul.f32 %v942_v7, %v942_v7  ;;  %v1260_v30 = vpop.f32.mrf.mxu2 }
 0x108   :  { %582 = vst [vmem:[%s1472_s2 + $0xe8] sm:$0xff] %v1185_v14 }
 0x109   :  { %v494_v61 = vadd.f32 %v493_v49, %v431_v46  ;;  %597 = vst [vmem:[%s1472_s2 + $0x160] sm:$0xff] %v1260_v30 }
 0x10e   :  { %v195_v31 = vpop.f32.mrf.mxu0  ;;  %v1206_v33 = vpop.f32.mrf.mxu1 }
 0x10f   :  { %567 = vst [vmem:[%s1472_s2 + $0x70] sm:$0xff] %v195_v31  ;;  %v432_v57 = vmul.f32 %v195_v31, %v195_v31  ;;  %v359_v5 = vadd.f32 %v358_v53, %v195_v31  ;;  %v1262_v31 = vpop.f32.mrf.mxu3 }
 0x110   :  { %583 = vst [vmem:[%s1472_s2 + $0xf0] sm:$0xff] %v1206_v33 }
 0x111   :  { %v495_v1 = vadd.f32 %v494_v61, %v432_v57  ;;  %609 = vst [vmem:[%s1472_s2 + $0x1c0] sm:$0xff] %v1262_v31  ;;  %v1284_v57 = vpop.f32.mrf.mxu2 }
 0x112   :  { %598 = vst [vmem:[%s1472_s2 + $0x168] sm:$0xff] %v1284_v57 }
 0x116   :  { %v198_v6 = vpop.f32.mrf.mxu0  ;;  %v1227_v8 = vpop.f32.mrf.mxu1 }
 0x117   :  { %v360_v9 = vadd.f32 %v359_v5, %v198_v6  ;;  %v433_v10 = vmul.f32 %v198_v6, %v198_v6  ;;  %568 = vst [vmem:[%s1472_s2 + $0x78] sm:$0xff] %v198_v6  ;;  %v1286_v61 = vpop.f32.mrf.mxu3 }
 0x118   :  { %584 = vst [vmem:[%s1472_s2 + $0xf8] sm:$0xff] %v1227_v8 }
 0x119   :  { %v361_v16 = vadd.f32 %v360_v9, %v942_v7  ;;  %v496_v17 = vadd.f32 %v495_v1, %v433_v10  ;;  %v436_v7 = vmul.f32 %v972_v19, %v972_v19  ;;  %610 = vst [vmem:[%s1472_s2 + $0x1c8] sm:$0xff] %v1286_v61  ;;  %v444_v9 = vmul.f32 %v1117_v58, %v1117_v58 }
 0x11b   :  { %v362_v22 = vadd.f32 %v361_v16, %v957_v11  ;;  %v497_v23 = vadd.f32 %v496_v17, %v434_v13  ;;  %v438_v11 = vmul.f32 %v999_v32, %v999_v32  ;;  %v445_v16 = vmul.f32 %v1138_v62, %v1138_v62 }
 0x11d   :  { %v363_v24 = vadd.f32 %v362_v22, %v972_v19  ;;  %v498_v25 = vadd.f32 %v497_v23, %v435_v21  ;;  %v1308_v21 = vpop.f32.mrf.mxu2 }
 0x11e   :  { %599 = vst [vmem:[%s1472_s2 + $0x170] sm:$0xff] %v1308_v21 }
 0x11f   :  { %v364_v28 = vadd.f32 %v363_v24, %v987_v26  ;;  %v499_v29 = vadd.f32 %v498_v25, %v436_v7  ;;  %v439_v26 = vmul.f32 %v1023_v39, %v1023_v39  ;;  %v1310_v22 = vpop.f32.mrf.mxu3  ;;  %v447_v24 = vmul.f32 %v1185_v14, %v1185_v14 }
 0x120   :  { %611 = vst [vmem:[%s1472_s2 + $0x1d0] sm:$0xff] %v1310_v22 }
 0x121   :  { %v365_v19 = vadd.f32 %v364_v28, %v999_v32  ;;  %v500_v34 = vadd.f32 %v499_v29, %v437_v27  ;;  %v441_v32 = vmul.f32 %v1060_v47, %v1060_v47  ;;  %v448_v28 = vmul.f32 %v1206_v33, %v1206_v33 }
 0x123   :  { %v366_v36 = vadd.f32 %v365_v19, %v1023_v39  ;;  %v501_v37 = vadd.f32 %v500_v34, %v438_v11  ;;  %v442_v39 = vmul.f32 %v1075_v50, %v1075_v50 }
 0x125   :  { %v502_v45 = vadd.f32 %v501_v37, %v439_v26  ;;  %v367_v46 = vadd.f32 %v366_v36, %v1042_v43  ;;  %v294_v19 = vpop.f32.mrf.mxu2 }
 0x126   :  { %600 = vst [vmem:[%s1472_s2 + $0x178] sm:$0xff] %v294_v19 }
 0x127   :  { %v368_v49 = vadd.f32 %v367_v46, %v1060_v47  ;;  %v503_v53 = vadd.f32 %v502_v45, %v440_v42  ;;  %v443_v47 = vmul.f32 %v1096_v54, %v1096_v54  ;;  %v1332_v34 = vpop.f32.mrf.mxu3  ;;  %v452_v42 = vmul.f32 %v1047_v44, %v1047_v44 }
 0x128   :  { %612 = vst [vmem:[%s1472_s2 + $0x1d8] sm:$0xff] %v1332_v34 }
 0x129   :  { %v369_v43 = vadd.f32 %v368_v49, %v1075_v50  ;;  %v504_v5 = vadd.f32 %v503_v53, %v441_v32 }
 0x12b   :  { %v370_v6 = vadd.f32 %v369_v43, %v1096_v54  ;;  %v505_v1 = vadd.f32 %v504_v5, %v442_v39  ;;  %v455_v43 = vmul.f32 %v1101_v55, %v1101_v55 }
 0x12d   :  { %v371_v10 = vadd.f32 %v370_v6, %v1117_v58  ;;  %v506_v13 = vadd.f32 %v505_v1, %v443_v47  ;;  %v446_v58 = vmul.f32 %v1159_v2, %v1159_v2  ;;  %v456_v47 = vmul.f32 %v1122_v59, %v1122_v59 }
 0x12f   :  { %v372_v50 = vadd.f32 %v371_v10, %v1138_v62  ;;  %v507_v17 = vadd.f32 %v506_v13, %v444_v9  ;;  %v1353_v53 = vpop.f32.mrf.mxu3  ;;  %v457_v9 = vmul.f32 %v1143_v63, %v1143_v63 }
 0x130   :  { %613 = vst [vmem:[%s1472_s2 + $0x1e0] sm:$0xff] %v1353_v53 }
 0x131   :  { %v508_v54 = vadd.f32 %v507_v17, %v445_v16  ;;  %v373_v23 = vadd.f32 %v372_v50, %v1159_v2  ;;  %v449_v2 = vmul.f32 %v1227_v8, %v1227_v8 }
 0x133   :  { %v509_v62 = vadd.f32 %v508_v54, %v446_v58  ;;  %v374_v7 = vadd.f32 %v373_v23, %v1185_v14  ;;  %v450_v14 = vmul.f32 %v1006_v35, %v1006_v35  ;;  %v460_v54 = vmul.f32 %v1211_v38, %v1211_v38 }
 0x135   :  { %v510_v25 = vadd.f32 %v509_v62, %v447_v24  ;;  %v375_v27 = vadd.f32 %v374_v7, %v1206_v33  ;;  %v451_v33 = vmul.f32 %v1029_v40, %v1029_v40  ;;  %v461_v7 = vmul.f32 %v1232_v12, %v1232_v12 }
 0x137   :  { %v511_v29 = vadd.f32 %v510_v25, %v448_v28  ;;  %v376_v11 = vadd.f32 %v375_v27, %v1227_v8 }
 0x139   :  { %v377_v26 = vadd.f32 %v376_v11, %v1006_v35  ;;  %v512_v36 = vadd.f32 %v511_v29, %v449_v2  ;;  %v453_v35 = vmul.f32 %v1065_v48, %v1065_v48  ;;  %v464_v11 = vmul.f32 %v1308_v21, %v1308_v21 }
 0x13b   :  { %v378_v8 = vadd.f32 %v377_v26, %v1029_v40  ;;  %v513_v37 = vadd.f32 %v512_v36, %v450_v14  ;;  %v454_v40 = vmul.f32 %v1080_v51, %v1080_v51  ;;  %v465_v14 = vmul.f32 %v294_v19, %v294_v19 }
 0x13d   :  { %v379_v45 = vadd.f32 %v378_v8, %v1047_v44  ;;  %v514_v46 = vadd.f32 %v513_v37, %v451_v33  ;;  %v706_v8 = vmov 0.0  }
 0x13e   :  { %54 = vst [vmem:[%s1473_s3] sm:$0x1] %v706_v8 }
 0x13f   :  { %v380_v32 = vadd.f32 %v379_v45, %v1065_v48  ;;  %v515_v49 = vadd.f32 %v514_v46, %v452_v42  ;;  %55 = vst [vmem:[%s1474_s4] sm:$0x1] %v706_v8  ;;  %v468_v45 = vmul.f32 %v1124_v60, %v1124_v60 }
 0x141   :  { %v381_v39 = vadd.f32 %v380_v32, %v1080_v51  ;;  %v516_v44 = vadd.f32 %v515_v49, %v453_v35  ;;  %v1371_v51 = vpop.f32.mrf.mxu3  ;;  %v469_v35 = vmul.f32 %v1145_v0, %v1145_v0 }
 0x142   :  { %614 = vst [vmem:[%s1472_s2 + $0x1e8] sm:$0xff] %v1371_v51 }
 0x143   :  { %v382_v5 = vadd.f32 %v381_v39, %v1101_v55  ;;  %v517_v48 = vadd.f32 %v516_v44, %v454_v40  ;;  %v458_v55 = vmul.f32 %v1164_v3, %v1164_v3  ;;  %v470_v40 = vmul.f32 %v1166_v4, %v1166_v4 }
 0x145   :  { %v518_v6 = vadd.f32 %v517_v48, %v455_v43  ;;  %v383_v1 = vadd.f32 %v382_v5, %v1122_v59  ;;  %v459_v59 = vmul.f32 %v1190_v18, %v1190_v18 }
 0x147   :  { %v384_v10 = vadd.f32 %v383_v1, %v1143_v63  ;;  %v519_v13 = vadd.f32 %v518_v6, %v456_v47 }
 0x149   :  { %v385_v50 = vadd.f32 %v384_v10, %v1164_v3  ;;  %v520_v16 = vadd.f32 %v519_v13, %v457_v9  ;;  %v1389_v3 = vpop.f32.mrf.mxu3 }
 0x14a   :  { %615 = vst [vmem:[%s1472_s2 + $0x1f0] sm:$0xff] %v1389_v3 }
 0x14b   :  { %v386_v17 = vadd.f32 %v385_v50, %v1190_v18  ;;  %v521_v63 = vadd.f32 %v520_v16, %v458_v55 }
 0x14d   :  { %v387_v23 = vadd.f32 %v386_v17, %v1211_v38  ;;  %v522_v58 = vadd.f32 %v521_v63, %v459_v59  ;;  %v462_v38 = vmul.f32 %v1260_v30, %v1260_v30  ;;  %v477_v59 = vmul.f32 %v1332_v34, %v1332_v34 }
 0x14f   :  { %v388_v62 = vadd.f32 %v387_v23, %v1232_v12  ;;  %v523_v24 = vadd.f32 %v522_v58, %v460_v54  ;;  %v463_v12 = vmul.f32 %v1284_v57, %v1284_v57  ;;  %v478_v54 = vmul.f32 %v1353_v53, %v1353_v53 }
 0x150   :  { %v479_v58 = vmul.f32 %v1371_v51, %v1371_v51 }
 0x151   :  { %v524_v18 = vadd.f32 %v523_v24, %v461_v7  ;;  %v389_v25 = vadd.f32 %v388_v62, %v1260_v30  ;;  %v342_v33 = vpop.f32.mrf.mxu3  ;;  %v466_v30 = vmul.f32 %v1082_v52, %v1082_v52  ;;  %v480_v7 = vmul.f32 %v1389_v3, %v1389_v3 }
 0x152   :  { %616 = vst [vmem:[%s1472_s2 + $0x1f8] sm:$0xff] %v342_v33 }
 0x153   :  { %v525_v27 = vadd.f32 %v524_v18, %v462_v38  ;;  %v390_v28 = vadd.f32 %v389_v25, %v1284_v57 }
 0x155   :  { %v526_v2 = vadd.f32 %v525_v27, %v463_v12  ;;  %v391_v29 = vadd.f32 %v390_v28, %v1308_v21  ;;  %v467_v21 = vmul.f32 %v1103_v56, %v1103_v56 }
 0x157   :  { %v527_v26 = vadd.f32 %v526_v2, %v464_v11  ;;  %v392_v36 = vadd.f32 %v391_v29, %v294_v19 }
 0x159   :  { %v393_v57 = vadd.f32 %v392_v36, %v1082_v52  ;;  %v528_v37 = vadd.f32 %v527_v26, %v465_v14 }
 0x15b   :  { %v394_v19 = vadd.f32 %v393_v57, %v1103_v56  ;;  %v529_v42 = vadd.f32 %v528_v37, %v466_v30  ;;  %v471_v56 = vmul.f32 %v1192_v20, %v1192_v20 }
 0x15d   :  { %v395_v52 = vadd.f32 %v394_v19, %v1124_v60  ;;  %v530_v46 = vadd.f32 %v529_v42, %v467_v21  ;;  %v472_v60 = vmul.f32 %v1213_v41, %v1213_v41 }
 0x15f   :  { %v396_v32 = vadd.f32 %v395_v52, %v1145_v0  ;;  %v531_v49 = vadd.f32 %v530_v46, %v468_v45  ;;  %v473_v0 = vmul.f32 %v1234_v15, %v1234_v15 }
 0x161   :  { %v397_v39 = vadd.f32 %v396_v32, %v1166_v4  ;;  %v532_v44 = vadd.f32 %v531_v49, %v469_v35  ;;  %v474_v4 = vmul.f32 %v1262_v31, %v1262_v31 }
 0x163   :  { %v398_v43 = vadd.f32 %v397_v39, %v1192_v20  ;;  %v533_v5 = vadd.f32 %v532_v44, %v470_v40  ;;  %v475_v20 = vmul.f32 %v1286_v61, %v1286_v61 }
 0x165   :  { %v534_v48 = vadd.f32 %v533_v5, %v471_v56  ;;  %v399_v47 = vadd.f32 %v398_v43, %v1213_v41  ;;  %v476_v41 = vmul.f32 %v1310_v22, %v1310_v22 }
 0x167   :  { %v400_v6 = vadd.f32 %v399_v47, %v1234_v15  ;;  %v535_v1 = vadd.f32 %v534_v48, %v472_v60 }
 0x169   :  { %v401_v9 = vadd.f32 %v400_v6, %v1262_v31  ;;  %v536_v10 = vadd.f32 %v535_v1, %v473_v0 }
 0x16b   :  { %v402_v13 = vadd.f32 %v401_v9, %v1286_v61  ;;  %v537_v55 = vadd.f32 %v536_v10, %v474_v4 }
 0x16d   :  { %v403_v50 = vadd.f32 %v402_v13, %v1310_v22  ;;  %v538_v16 = vadd.f32 %v537_v55, %v475_v20 }
 0x16f   :  { %v404_v15 = vadd.f32 %v403_v50, %v1332_v34  ;;  %v539_v17 = vadd.f32 %v538_v16, %v476_v41  ;;  %v481_v34 = vmul.f32 %v342_v33, %v342_v33 }
 0x171   :  { %v540_v31 = vadd.f32 %v539_v17, %v477_v59  ;;  %v405_v63 = vadd.f32 %v404_v15, %v1353_v53 }
 0x173   :  { %v541_v61 = vadd.f32 %v540_v31, %v478_v54  ;;  %v406_v23 = vadd.f32 %v405_v63, %v1371_v51  ;;  %v345_v51 = vld [vmem:[%s1473_s3] sm:$0x1] }
 0x175   :  { %v542_v22 = vadd.f32 %v541_v61, %v479_v58  ;;  %v407_v62 = vadd.f32 %v406_v23, %v1389_v3  ;;  %v417_v3 = vld [vmem:[%s1474_s4] sm:$0x1] }
 0x177   :  { %v543_v24 = vadd.f32 %v542_v22, %v480_v7  ;;  %v408_v18 = vadd.f32 %v407_v62, %v342_v33 }
 0x179   :  { %v409_v25 = vrot.slane %v408_v18, 4  ;;  %v544_v38 = vadd.f32 %v543_v24, %v481_v34 }
 0x17b   :  { %v410_v27 = vadd.f32 %v409_v25, %v408_v18  ;;  %v545_v28 = vrot.slane %v544_v38, 4 }
 0x17d   :  { %v411_v53 = vrot.slane %v410_v27, 2  ;;  %v546_v12 = vadd.f32 %v545_v28, %v544_v38 }
 0x17f   :  { %v412_v2 = vadd.f32 %v411_v53, %v410_v27  ;;  %v547_v29 = vrot.slane %v546_v12, 2 }
 0x181   :  { %v413_v11 = vrot.slane %v412_v2, 1  ;;  %v548_v14 = vadd.f32 %v547_v29, %v546_v12 }
 0x183   :  { %v414_v26 = vadd.f32 %v413_v11, %v412_v2  ;;  %v549_v36 = vrot.slane %v548_v14, 1 }
 0x185   :  { %v415_v33 = vadd.f32 %v414_v26, %v345_v51  ;;  %v550_v8 = vadd.f32 %v549_v36, %v548_v14 }
 0x187   :  { %416 = vst [vmem:[%s1473_s3] sm:$0x1] %v415_v33  ;;  %v551_v30 = vadd.f32 %v550_v8, %v417_v3 }
 0x189   :  { %552 = vst [vmem:[%s1474_s4] sm:$0x1] %v551_v30 }

</bundles_post_ra>
